<compile_context>
chip_gen: v7x
topology: tpu7x:2x2x1
jax: 0.10.0
libtpu: 0.0.40
codegen_flags: <defaults>
</compile_context>

<pallas_src>
import jax
import jax.numpy as jnp
from jax.experimental import pallas as pl
from jax.experimental.pallas import tpu as pltpu

HIDDEN_SIZES = (1024, 512, 256, 128)


def make_actor_kernel(action_size):
    """Builds the fused 5-layer kernel for a given action_size."""
    h1, h2, h3, h4 = HIDDEN_SIZES
    # Bias offsets inside the packed (1, total) bias array.
    o1 = 0
    o2 = o1 + h1
    o3 = o2 + h2
    o4 = o3 + h3
    o5 = o4 + h4

    def kernel(x_ref, w1_ref, w5_ref, bias_ref,      # inputs (VMEM / VMEM / VMEM / VMEM)
               w2_hbm, w3_hbm, w4_hbm,               # inputs (HBM via pl.ANY)
               out_ref,                              # output (VMEM)
               w2_buf, w3_buf, w4_buf, sem):         # scratch (VMEM x3, DMA sems)
        # Kick off all remaining-layer weight DMAs up front; they land while the
        # earlier (cheap) layers compute.  w1/w5/bias are tiny and auto-DMA'd.
        cp2 = pltpu.make_async_copy(w2_hbm, w2_buf, sem.at[0])
        cp3 = pltpu.make_async_copy(w3_hbm, w3_buf, sem.at[1])
        cp4 = pltpu.make_async_copy(w4_hbm, w4_buf, sem.at[2])
        cp2.start()
        cp3.start()
        cp4.start()

        x = x_ref[...]

        # Layer 1: (B, S) @ (S, 1024) + b1, ReLU
        h = jnp.dot(x.astype(jnp.bfloat16), w1_ref[...],
                    preferred_element_type=jnp.float32) + bias_ref[:, o1:o2]
        h = jnp.maximum(h, 0.0)

        # Layer 2: (B, 1024) @ (1024, 512) + b2, ReLU
        cp2.wait()
        h = jnp.dot(h.astype(jnp.bfloat16), w2_buf[...],
                    preferred_element_type=jnp.float32) + bias_ref[:, o2:o3]
        h = jnp.maximum(h, 0.0)

        # Layer 3: (B, 512) @ (512, 256) + b3, ReLU
        cp3.wait()
        h = jnp.dot(h.astype(jnp.bfloat16), w3_buf[...],
                    preferred_element_type=jnp.float32) + bias_ref[:, o3:o4]
        h = jnp.maximum(h, 0.0)

        # Layer 4: (B, 256) @ (256, 128) + b4, ReLU
        cp4.wait()
        h = jnp.dot(h.astype(jnp.bfloat16), w4_buf[...],
                    preferred_element_type=jnp.float32) + bias_ref[:, o4:o5]
        h = jnp.maximum(h, 0.0)

        # Layer 5: (B, 128) @ (128, A) + b5, tanh
        h = jnp.dot(h.astype(jnp.bfloat16), w5_ref[...],
                    preferred_element_type=jnp.float32) + bias_ref[:, o5:o5 + action_size]
        out_ref[...] = jnp.tanh(h)

    return kernel


@jax.jit
def actor_forward(state, params):
    """state: (B, state_size) f32 -> (B, action_size) f32.

    params: list of 5 (weight, bias) pairs with weight stored as
    (in_features, out_features) in bfloat16 and bias as (1, out_features) f32.
    """
    (w1, b1), (w2, b2), (w3, b3), (w4, b4), (w5, b5) = params
    batch = state.shape[0]
    action_size = w5.shape[1]

    # Pack the five biases into a single f32 array -> one DMA instead of five.
    bias = jnp.concatenate([b1, b2, b3, b4, b5], axis=1)

    kernel = make_actor_kernel(action_size)

    vmem = pl.BlockSpec(memory_space=pltpu.MemorySpace.VMEM)
    hbm = pl.BlockSpec(memory_space=pl.ANY)

    return pl.pallas_call(
        kernel,
        out_shape=jax.ShapeDtypeStruct((batch, action_size), jnp.float32),
        in_specs=[vmem, vmem, vmem, vmem, hbm, hbm, hbm],
        out_specs=vmem,
        scratch_shapes=[
            pltpu.VMEM(w2.shape, w2.dtype),   # (1024, 512) bf16  ~1 MiB
            pltpu.VMEM(w3.shape, w3.dtype),   # (512, 256)  bf16  ~256 KiB
            pltpu.VMEM(w4.shape, w4.dtype),   # (256, 128)  bf16  ~64 KiB
            pltpu.SemaphoreType.DMA((3,)),
        ],
        compiler_params=pltpu.CompilerParams(vmem_limit_bytes=16 << 20),
    )(state, w1, w5, bias, w2, w3, w4)


def init_params(key, state_size, action_size):
    """Deterministic init mirroring the PyTorch reset_parameters semantics.

    hidden_init in the reference uses weight.size()[0] (= out_features) as the
    fan; we reproduce that limit. Biases keep the default Linear init
    (uniform in +-1/sqrt(in_features)).  Weights are stored in bfloat16 (perf),
    biases stay in f32.
    """
    sizes = [state_size, *HIDDEN_SIZES, action_size]
    params = []
    keys = jax.random.split(key, 10)
    for i in range(5):
        fan_in, fan_out = sizes[i], sizes[i + 1]
        if i < 4:
            lim_w = 1.0 / jnp.sqrt(jnp.float32(fan_out))  # weight.size()[0] == out_features
        else:
            lim_w = jnp.float32(3e-3)
        lim_b = 1.0 / jnp.sqrt(jnp.float32(fan_in))
        w = jax.random.uniform(keys[2 * i], (fan_in, fan_out),
                               minval=-lim_w, maxval=lim_w, dtype=jnp.float32)
        b = jax.random.uniform(keys[2 * i + 1], (1, fan_out),
                               minval=-lim_b, maxval=lim_b, dtype=jnp.float32)
        params.append((w.astype(jnp.bfloat16), b))
    return params


def reference_forward(state, params):
    """Pure-JAX reference doing the same bf16-weight / f32-accumulate math."""
    h = state
    for i, (w, b) in enumerate(params):
        h = jnp.dot(h.astype(jnp.bfloat16), w,
                    preferred_element_type=jnp.float32) + b
        if i < 4:
            h = jnp.maximum(h, 0.0)
        else:
            h = jnp.tanh(h)
    return h


if __name__ == "__main__":
    key = jax.random.PRNGKey(0)
    k_params, k_state = jax.random.split(key)

    batch = 2
    state_size = 32
    action_size = 4

    params = init_params(k_params, state_size, action_size)
    state = jax.random.normal(k_state, (batch, state_size), dtype=jnp.float32)

    out = actor_forward(state, params)
    out = jax.block_until_ready(out)

    ref = reference_forward(state, params)
    assert out.shape == (batch, action_size)
    assert jnp.allclose(out, ref, atol=2e-4, rtol=2e-4), "mismatch vs reference"

    print("KERNEL_OK")
</pallas_src>

<mosaic_0001>
module attributes {stable_mosaic.version = 11 : i64} {
  func.func @kernel(%arg0: memref<2x32xf32, #tpu.memory_space<vmem>>, %arg1: memref<32x1024xbf16, #tpu.memory_space<vmem>>, %arg2: memref<128x4xbf16, #tpu.memory_space<vmem>>, %arg3: memref<1x1924xf32, #tpu.memory_space<vmem>>, %arg4: memref<1024x512xbf16, #tpu.memory_space<any>>, %arg5: memref<512x256xbf16, #tpu.memory_space<any>>, %arg6: memref<256x128xbf16, #tpu.memory_space<any>>, %arg7: memref<2x4xf32, #tpu.memory_space<vmem>>, %arg8: memref<1024x512xbf16, #tpu.memory_space<vmem>>, %arg9: memref<512x256xbf16, #tpu.memory_space<vmem>>, %arg10: memref<256x128xbf16, #tpu.memory_space<vmem>>, %arg11: memref<3x!tpu.dma_semaphore, #tpu.memory_space<semaphore_mem>>) attributes {dimension_semantics = [], scalar_prefetch = 0 : i64, scratch_operands = 4 : i64, tpu.core_type = #tpu.core_type<tc>} {
    %c0_i32 = arith.constant 0 : i32
    %0 = tpu.memref_slice %arg11[%c0_i32] : memref<3x!tpu.dma_semaphore, #tpu.memory_space<semaphore_mem>> -> memref<1x!tpu.dma_semaphore, #tpu.memory_space<semaphore_mem>>
    %1 = tpu.memref_squeeze %0 : memref<1x!tpu.dma_semaphore, #tpu.memory_space<semaphore_mem>> -> memref<!tpu.dma_semaphore, #tpu.memory_space<semaphore_mem>>
    tpu.enqueue_dma source(%arg4 : memref<1024x512xbf16, #tpu.memory_space<any>>) target(%arg8 : memref<1024x512xbf16, #tpu.memory_space<vmem>>) target_semaphore(%1 : memref<!tpu.dma_semaphore, #tpu.memory_space<semaphore_mem>>)
    %c1_i32 = arith.constant 1 : i32
    %2 = tpu.memref_slice %arg11[%c1_i32] : memref<3x!tpu.dma_semaphore, #tpu.memory_space<semaphore_mem>> -> memref<1x!tpu.dma_semaphore, #tpu.memory_space<semaphore_mem>>
    %3 = tpu.memref_squeeze %2 : memref<1x!tpu.dma_semaphore, #tpu.memory_space<semaphore_mem>> -> memref<!tpu.dma_semaphore, #tpu.memory_space<semaphore_mem>>
    tpu.enqueue_dma source(%arg5 : memref<512x256xbf16, #tpu.memory_space<any>>) target(%arg9 : memref<512x256xbf16, #tpu.memory_space<vmem>>) target_semaphore(%3 : memref<!tpu.dma_semaphore, #tpu.memory_space<semaphore_mem>>)
    %c2_i32 = arith.constant 2 : i32
    %4 = tpu.memref_slice %arg11[%c2_i32] : memref<3x!tpu.dma_semaphore, #tpu.memory_space<semaphore_mem>> -> memref<1x!tpu.dma_semaphore, #tpu.memory_space<semaphore_mem>>
    %5 = tpu.memref_squeeze %4 : memref<1x!tpu.dma_semaphore, #tpu.memory_space<semaphore_mem>> -> memref<!tpu.dma_semaphore, #tpu.memory_space<semaphore_mem>>
    tpu.enqueue_dma source(%arg6 : memref<256x128xbf16, #tpu.memory_space<any>>) target(%arg10 : memref<256x128xbf16, #tpu.memory_space<vmem>>) target_semaphore(%5 : memref<!tpu.dma_semaphore, #tpu.memory_space<semaphore_mem>>)
    %c0 = arith.constant 0 : index
    %c0_0 = arith.constant 0 : index
    %6 = vector.load %arg0[%c0, %c0_0] : memref<2x32xf32, #tpu.memory_space<vmem>>, vector<2x32xf32>
    %7 = arith.truncf %6 : vector<2x32xf32> to vector<2x32xbf16>
    %c0_1 = arith.constant 0 : index
    %c0_2 = arith.constant 0 : index
    %8 = vector.load %arg1[%c0_1, %c0_2] : memref<32x1024xbf16, #tpu.memory_space<vmem>>, vector<32x1024xbf16>
    %cst = arith.constant dense<0.000000e+00> : vector<2x1024xf32>
    %9 = tpu.matmul %7, %8, %cst {dimension_numbers = #tpu.dot_dimension_numbers<[1], [0], [0], [1], [0, 0, 1, 1], [], []>} : vector<2x32xbf16>, vector<32x1024xbf16>, vector<2x1024xf32> -> vector<2x1024xf32>
    %c0_3 = arith.constant 0 : index
    %c0_4 = arith.constant 0 : index
    %10 = vector.load %arg3[%c0_3, %c0_4] : memref<1x1924xf32, #tpu.memory_space<vmem>>, vector<1x1024xf32>
    %11 = vector.broadcast %10 : vector<1x1024xf32> to vector<2x1024xf32>
    %12 = arith.addf %9, %11 : vector<2x1024xf32>
    %cst_5 = arith.constant 0.000000e+00 : f32
    %13 = vector.broadcast %cst_5 : f32 to vector<2x1024xf32>
    %14 = arith.maximumf %12, %13 : vector<2x1024xf32>
    %c0_i32_6 = arith.constant 0 : i32
    %15 = tpu.memref_slice %arg11[%c0_i32_6] : memref<3x!tpu.dma_semaphore, #tpu.memory_space<semaphore_mem>> -> memref<1x!tpu.dma_semaphore, #tpu.memory_space<semaphore_mem>>
    %16 = tpu.memref_squeeze %15 : memref<1x!tpu.dma_semaphore, #tpu.memory_space<semaphore_mem>> -> memref<!tpu.dma_semaphore, #tpu.memory_space<semaphore_mem>>
    tpu.wait_dma2 semaphore(%16 : memref<!tpu.dma_semaphore, #tpu.memory_space<semaphore_mem>>) src(%arg4 : memref<1024x512xbf16, #tpu.memory_space<any>>) dst(%arg8 : memref<1024x512xbf16, #tpu.memory_space<vmem>>)
    %17 = arith.truncf %14 : vector<2x1024xf32> to vector<2x1024xbf16>
    %c0_7 = arith.constant 0 : index
    %c0_8 = arith.constant 0 : index
    %18 = vector.load %arg8[%c0_7, %c0_8] : memref<1024x512xbf16, #tpu.memory_space<vmem>>, vector<1024x512xbf16>
    %cst_9 = arith.constant dense<0.000000e+00> : vector<2x512xf32>
    %19 = tpu.matmul %17, %18, %cst_9 {dimension_numbers = #tpu.dot_dimension_numbers<[1], [0], [0], [1], [0, 0, 1, 1], [], []>} : vector<2x1024xbf16>, vector<1024x512xbf16>, vector<2x512xf32> -> vector<2x512xf32>
    %c0_10 = arith.constant 0 : index
    %c1024 = arith.constant 1024 : index
    %20 = vector.load %arg3[%c0_10, %c1024] : memref<1x1924xf32, #tpu.memory_space<vmem>>, vector<1x512xf32>
    %21 = vector.broadcast %20 : vector<1x512xf32> to vector<2x512xf32>
    %22 = arith.addf %19, %21 : vector<2x512xf32>
    %cst_11 = arith.constant 0.000000e+00 : f32
    %23 = vector.broadcast %cst_11 : f32 to vector<2x512xf32>
    %24 = arith.maximumf %22, %23 : vector<2x512xf32>
    %c1_i32_12 = arith.constant 1 : i32
    %25 = tpu.memref_slice %arg11[%c1_i32_12] : memref<3x!tpu.dma_semaphore, #tpu.memory_space<semaphore_mem>> -> memref<1x!tpu.dma_semaphore, #tpu.memory_space<semaphore_mem>>
    %26 = tpu.memref_squeeze %25 : memref<1x!tpu.dma_semaphore, #tpu.memory_space<semaphore_mem>> -> memref<!tpu.dma_semaphore, #tpu.memory_space<semaphore_mem>>
    tpu.wait_dma2 semaphore(%26 : memref<!tpu.dma_semaphore, #tpu.memory_space<semaphore_mem>>) src(%arg5 : memref<512x256xbf16, #tpu.memory_space<any>>) dst(%arg9 : memref<512x256xbf16, #tpu.memory_space<vmem>>)
    %27 = arith.truncf %24 : vector<2x512xf32> to vector<2x512xbf16>
    %c0_13 = arith.constant 0 : index
    %c0_14 = arith.constant 0 : index
    %28 = vector.load %arg9[%c0_13, %c0_14] : memref<512x256xbf16, #tpu.memory_space<vmem>>, vector<512x256xbf16>
    %cst_15 = arith.constant dense<0.000000e+00> : vector<2x256xf32>
    %29 = tpu.matmul %27, %28, %cst_15 {dimension_numbers = #tpu.dot_dimension_numbers<[1], [0], [0], [1], [0, 0, 1, 1], [], []>} : vector<2x512xbf16>, vector<512x256xbf16>, vector<2x256xf32> -> vector<2x256xf32>
    %c0_16 = arith.constant 0 : index
    %c1536 = arith.constant 1536 : index
    %30 = vector.load %arg3[%c0_16, %c1536] : memref<1x1924xf32, #tpu.memory_space<vmem>>, vector<1x256xf32>
    %31 = vector.broadcast %30 : vector<1x256xf32> to vector<2x256xf32>
    %32 = arith.addf %29, %31 : vector<2x256xf32>
    %cst_17 = arith.constant 0.000000e+00 : f32
    %33 = vector.broadcast %cst_17 : f32 to vector<2x256xf32>
    %34 = arith.maximumf %32, %33 : vector<2x256xf32>
    %c2_i32_18 = arith.constant 2 : i32
    %35 = tpu.memref_slice %arg11[%c2_i32_18] : memref<3x!tpu.dma_semaphore, #tpu.memory_space<semaphore_mem>> -> memref<1x!tpu.dma_semaphore, #tpu.memory_space<semaphore_mem>>
    %36 = tpu.memref_squeeze %35 : memref<1x!tpu.dma_semaphore, #tpu.memory_space<semaphore_mem>> -> memref<!tpu.dma_semaphore, #tpu.memory_space<semaphore_mem>>
    tpu.wait_dma2 semaphore(%36 : memref<!tpu.dma_semaphore, #tpu.memory_space<semaphore_mem>>) src(%arg6 : memref<256x128xbf16, #tpu.memory_space<any>>) dst(%arg10 : memref<256x128xbf16, #tpu.memory_space<vmem>>)
    %37 = arith.truncf %34 : vector<2x256xf32> to vector<2x256xbf16>
    %c0_19 = arith.constant 0 : index
    %c0_20 = arith.constant 0 : index
    %38 = vector.load %arg10[%c0_19, %c0_20] : memref<256x128xbf16, #tpu.memory_space<vmem>>, vector<256x128xbf16>
    %cst_21 = arith.constant dense<0.000000e+00> : vector<2x128xf32>
    %39 = tpu.matmul %37, %38, %cst_21 {dimension_numbers = #tpu.dot_dimension_numbers<[1], [0], [0], [1], [0, 0, 1, 1], [], []>} : vector<2x256xbf16>, vector<256x128xbf16>, vector<2x128xf32> -> vector<2x128xf32>
    %c0_22 = arith.constant 0 : index
    %c1792 = arith.constant 1792 : index
    %40 = vector.load %arg3[%c0_22, %c1792] : memref<1x1924xf32, #tpu.memory_space<vmem>>, vector<1x128xf32>
    %41 = vector.broadcast %40 : vector<1x128xf32> to vector<2x128xf32>
    %42 = arith.addf %39, %41 : vector<2x128xf32>
    %cst_23 = arith.constant 0.000000e+00 : f32
    %43 = vector.broadcast %cst_23 : f32 to vector<2x128xf32>
    %44 = arith.maximumf %42, %43 : vector<2x128xf32>
    %45 = arith.truncf %44 : vector<2x128xf32> to vector<2x128xbf16>
    %c0_24 = arith.constant 0 : index
    %c0_25 = arith.constant 0 : index
    %46 = vector.load %arg2[%c0_24, %c0_25] : memref<128x4xbf16, #tpu.memory_space<vmem>>, vector<128x4xbf16>
    %cst_26 = arith.constant dense<0.000000e+00> : vector<2x4xf32>
    %47 = tpu.matmul %45, %46, %cst_26 {dimension_numbers = #tpu.dot_dimension_numbers<[1], [0], [0], [1], [0, 0, 1, 1], [], []>} : vector<2x128xbf16>, vector<128x4xbf16>, vector<2x4xf32> -> vector<2x4xf32>
    %c0_27 = arith.constant 0 : index
    %c1920 = arith.constant 1920 : index
    %48 = vector.load %arg3[%c0_27, %c1920] : memref<1x1924xf32, #tpu.memory_space<vmem>>, vector<1x4xf32>
    %49 = vector.broadcast %48 : vector<1x4xf32> to vector<2x4xf32>
    %50 = arith.addf %47, %49 : vector<2x4xf32>
    %51 = math.tanh %50 : vector<2x4xf32>
    %c0_28 = arith.constant 0 : index
    %c0_29 = arith.constant 0 : index
    %52 = vector.load %arg7[%c0_28, %c0_29] : memref<2x4xf32, #tpu.memory_space<vmem>>, vector<2x4xf32>
    tpu.vector_store %arg7[%c0_28, %c0_29], %51 {strides = array<i32>} : memref<2x4xf32, #tpu.memory_space<vmem>>, vector<2x4xf32>,
    return
  }
}

</mosaic_0001>

<bundles_post_ra>
// kernel: actor_forward.1
= control target key start
LH: loop header
LB: loop body
LE: loop exit
PB: predicated region body
PF: predicated region fallthrough
CT: control target
= control target key end

     0   :  { %12 = vsyncpa [#allocation7], 0  ;;  %s2090_s0 = inlined_call_operand.hbm [shape: f32[2,32], index: 0, kind: input, shape index: {}]   ;;  %s2091_s1 = inlined_call_operand.hbm [shape: bf16[32,1024], index: 1, kind: input, shape index: {}]   ;;  %s2092_s2 = inlined_call_operand.vmem [shape: bf16[128,4], index: 2, kind: input, shape index: {}]   ;;  %s2093_s3 = inlined_call_operand.vmem [shape: f32[1,1924], index: 3, kind: input, shape index: {}]   ;;  %s2094_s4 = inlined_call_operand.hbm [shape: bf16[1024,512], index: 4, kind: input, shape index: {}]   ;;  %s2095_s5 = inlined_call_operand.hbm [shape: bf16[512,256], index: 5, kind: input, shape index: {}]   ;;  %s2096_s6 = inlined_call_operand.vmem [shape: bf16[256,128], index: 6, kind: input, shape index: {}]   ;;  %s2097_s7 = inlined_call_operand.hbm [shape: f32[2,4], index: 7, kind: output, shape index: {}]  }
   0x1   :  { %13 = vsyncpa [#allocation10], 0 }
   0x2   :  { %14 = vsyncpa [#allocation8], 0  ;;  %s1755_s24 = smov [#allocation6]   ;;  %s1756_s26 = smov [#allocation9]  }
   0x3   :  { %s21_s25 = sshll.u32 %s1755_s24, 4  ;;  %s30_s27 = sshll.u32 %s1756_s26, 4  ;;  %s22_s25 = int_to_ptr.vmem [resolvable:$true] %s21_s25  ;;  %s1814_s27 = int_to_ptr.vmem [resolvable:$true] %s30_s27 }
   0x4   :  { %s1677_s30 = scalar_lea.hbm %s2090_s0, 32 }
   0x5   :  { %p1678_p0 = scmp.ne.s32.totalorder %s2090_s0, %s1677_s30  ;;  %p1681_p1 = scmp.lt.u32.totalorder %s1677_s30, %s2090_s0 }
   0x7   :  { %p1683_p2 = pnand %p1681_p1, %p1678_p0 }
   0x9   :  { %1686 = shalt.err (!%p1683_p2)
}
   0xa   :  { %s1687_s12 = scalar_lea.vmem %s22_s25, 32  ;;  %p1692_p4 = scmp.lt.s32.totalorder %s22_s25, %s22_s25 }
   0xb   :  { %p1688_p3 = scmp.ne.s32.totalorder %s22_s25, %s1687_s12  ;;  %p1693_p5 = scmp.lt.s32.totalorder %s1687_s12, %s1687_s12 }
   0xd   :  { %p1694_p6 = por %p1693_p5, %p1692_p4 }
   0xf   :  { %p1695_p7 = pnand %p1694_p6, %p1688_p3 }
  0x11   :  { %1698 = shalt.err (!%p1695_p7)
}
  0x12   :  { %24 = dma.hbm_to_vmem [thread:$0]  %s2090_s0, 32, %s22_s25, [#allocation7]  }
  0x13   :  { %s1699_s17 = scalar_lea.hbm %s2091_s1, 2048 }
  0x14   :  { %p1700_p8 = scmp.ne.s32.totalorder %s2091_s1, %s1699_s17  ;;  %p1703_p9 = scmp.lt.u32.totalorder %s1699_s17, %s2091_s1 }
  0x16   :  { %p1705_p10 = pnand %p1703_p9, %p1700_p8 }
  0x18   :  { %1708 = shalt.err (!%p1705_p10)
}
  0x19   :  { %s1709_s22 = scalar_lea.vmem %s1814_s27, 2048  ;;  %p1714_p12 = scmp.lt.s32.totalorder %s1814_s27, %s1814_s27 }
  0x1a   :  { %p1710_p11 = scmp.ne.s32.totalorder %s1814_s27, %s1709_s22  ;;  %p1715_p13 = scmp.lt.s32.totalorder %s1709_s22, %s1709_s22 }
  0x1c   :  { %p1716_p0 = por %p1715_p13, %p1714_p12 }
  0x1e   :  { %p1717_p1 = pnand %p1716_p0, %p1710_p11 }
  0x20   :  { %1720 = shalt.err (!%p1717_p1)
}
  0x21   :  { %s1757_s0 = smov 512   ;;  %s1758_s23 = smov 32  }
  0x22   :  { %36 = dma.hbm_to_vmem [thread:$0]  %s2091_s1, 2048, %s1814_s27, [#allocation10], %s1757_s0, %s1757_s0, %s1758_s23  }
  0x23   :  { %1743 = dma.done.wait [#allocation7], 32  }
  0x24   :  { %1744 = vsyncadd [#allocation7], 4294967264 }
  0x25   :  { %1745 = dma.done.wait [#allocation10], 2048  }
  0x26   :  { %1746 = vsyncadd [#allocation10], 4294965248  ;;  %s52_s26 = sld [smem:[#allocation0]]   ;;  %64 = sst [smem:[#allocation13]] %s1757_s0 }
  0x27   :  { %66 = sst [smem:[#allocation13 + $0x1]] %s1757_s0  ;;  %s1759_s28 = smov [#allocation2]  }
  0x28   :  { %s60_s29 = sshll.u32 %s1759_s28, 4  ;;  %s1760_s30 = smov 4   ;;  %s61_s29 = int_to_ptr.vmem [resolvable:$true] %s60_s29 }
  0x29   :  { %68 = sst [smem:[#allocation13 + $0x2]] %s1760_s30  ;;  %s1761_s8 = smov 64  }
  0x2a   :  { %70 = sst [smem:[#allocation13 + $0x3]] %s1761_s8  ;;  %s1762_s9 = smov 128  }
  0x2b   :  { %72 = sst [smem:[#allocation13 + $0x4]] %s1762_s9  ;;  %s1763_s11 = smov 2  }
  0x2c   :  { %s1526_s10 = sshll.u32 %s52_s26, 26  ;;  %74 = sst [smem:[#allocation13 + $0x5]] %s1763_s11 }
  0x2d   :  { %s1527_s1 = sadd.s32 134217728, %s1526_s10  ;;  %s1764_s27 = smov 256  }
  0x2e   :  { %76 = sst [smem:[#allocation13 + $0x6]] %s1764_s27  ;;  %s1765_s12 = smov [#allocation5]  }
  0x2f   :  { %78 = sst [smem:[#allocation13 + $0x7]] %s1761_s8  ;;  %s1766_s13 = smov [#allocation12]  }
  0x30   :  { %80 = sst [smem:[#allocation13 + $0x8]] %s1760_s30  ;;  %s1767_s16 = smov [#allocation3]  }
  0x31   :  { %82 = dma.general %s2094_s4, 32768, %s61_s29, %s1765_s12, %s1766_s13, [#allocation13], %s1527_s1, 0  }
  0x32   :  { %99 = sst [smem:[#allocation15]] %s1764_s27  ;;  %s95_s17 = sshll.u32 %s1767_s16, 4  ;;  %s96_s17 = int_to_ptr.vmem [resolvable:$true] %s95_s17 }
  0x33   :  { %101 = sst [smem:[#allocation15 + $0x1]] %s1764_s27  ;;  %s1768_s18 = smov [#allocation5 + $0x1]  }
  0x34   :  { %103 = sst [smem:[#allocation15 + $0x2]] %s1763_s11  ;;  %s1769_s19 = smov [#allocation14]  }
  0x35   :  { %105 = sst [smem:[#allocation15 + $0x3]] %s1761_s8 }
  0x36   :  { %107 = sst [smem:[#allocation15 + $0x4]] %s1762_s9 }
  0x37   :  { %109 = sst [smem:[#allocation15 + $0x5]] %s1763_s11 }
  0x38   :  { %111 = sst [smem:[#allocation15 + $0x6]] %s1762_s9 }
  0x39   :  { %113 = sst [smem:[#allocation15 + $0x7]] %s1761_s8 }
  0x3a   :  { %115 = sst [smem:[#allocation15 + $0x8]] %s1760_s30 }
  0x3b   :  { %117 = dma.general %s2095_s5, 8192, %s96_s17, %s1768_s18, %s1769_s19, [#allocation15], %s1527_s1, 0  }
  0x3c   :  { %v1854_v0 = vld [vmem:[%s2096_s6] sm:$0xff]  ;;  %v1859_v1 = vld [vmem:[%s2096_s6 + $0x8] sm:$0xff]  ;;  %v1864_v2 = vld [vmem:[%s2096_s6 + $0x10] sm:$0xff] }
  0x3d   :  { %v1869_v3 = vld [vmem:[%s2096_s6 + $0x18] sm:$0xff]  ;;  %v1874_v4 = vld [vmem:[%s2096_s6 + $0x20] sm:$0xff]  ;;  %v1879_v5 = vld [vmem:[%s2096_s6 + $0x28] sm:$0xff] }
  0x3e   :  { %v1884_v6 = vld [vmem:[%s2096_s6 + $0x30] sm:$0xff]  ;;  %v1889_v7 = vld [vmem:[%s2096_s6 + $0x38] sm:$0xff]  ;;  %v1894_v8 = vld [vmem:[%s2096_s6 + $0x40] sm:$0xff] }
  0x3f   :  { %v1899_v9 = vld [vmem:[%s2096_s6 + $0x48] sm:$0xff]  ;;  %v1904_v10 = vld [vmem:[%s2096_s6 + $0x50] sm:$0xff]  ;;  %v1909_v11 = vld [vmem:[%s2096_s6 + $0x58] sm:$0xff] }
  0x40   :  { %v1914_v12 = vld [vmem:[%s2096_s6 + $0x60] sm:$0xff]  ;;  %v1919_v13 = vld [vmem:[%s2096_s6 + $0x68] sm:$0xff]  ;;  %v1924_v14 = vld [vmem:[%s2096_s6 + $0x70] sm:$0xff] }
  0x41   :  { %v1929_v15 = vld [vmem:[%s2096_s6 + $0x78] sm:$0xff] }
  0x42   :  { %190 = vsyncadd [#allocation5 + $0x2], 2048  ;;  %v193_v16 = vld [vmem:[#allocation9] sm:$0xff]  ;;  %v1770_v22 = vmov 0   ;;  %v194_v24 = vld [vmem:[#allocation9 + $0x8] sm:$0xff]  ;;  %vm331_vm0 = vcmask 261120   ;;  %v211_v51 = vlaneseq }
  0x43   :  { %v197_v17 = vld [vmem:[#allocation9 + $0x20] sm:$0xff]  ;;  %367 = vmatprep.mubr.bf16.mxu1 %v1770_v22  ;;  %v198_v25 = vld [vmem:[#allocation9 + $0x28] sm:$0xff]  ;;  %v191_v27 = vld [vmem:[#allocation6] sm:$0x3] }
  0x44   :  { %v1531_v18 = vcombine.high %v193_v16, %v197_v17  ;;  %v1530_v19 = vcombine.low %v193_v16, %v197_v17  ;;  %v201_v20 = vld [vmem:[#allocation9 + $0x40] sm:$0xff]  ;;  %v1533_v28 = vcombine.high %v194_v24, %v198_v25  ;;  %v202_v29 = vld [vmem:[#allocation9 + $0x48] sm:$0xff]  ;;  %v192_v31 = vpack.c.bf16 %v191_v27, %v191_v27  ;;  %v195_v34 = vld [vmem:[#allocation9 + $0x10] sm:$0xff] }
  0x45   :  { %v205_v21 = vld [vmem:[#allocation9 + $0x60] sm:$0xff]  ;;  %v206_v30 = vld [vmem:[#allocation9 + $0x68] sm:$0xff]  ;;  %v1532_v32 = vcombine.low %v194_v24, %v198_v25  ;;  %v199_v35 = vld [vmem:[#allocation9 + $0x30] sm:$0xff]  ;;  %v1935_v52 = vshrl.u32 %v211_v51, 7 }
  0x46   :  { %v1539_v23 = vcombine.high %v201_v20, %v205_v21  ;;  %335 = vmatprep.subr.bf16.mxu1 %v1531_v18  ;;  %v1538_v26 = vcombine.low %v201_v20, %v205_v21  ;;  %v1541_v33 = vcombine.high %v202_v29, %v206_v30  ;;  %v1540_v36 = vcombine.low %v202_v29, %v206_v30  ;;  %v203_v38 = vld [vmem:[#allocation9 + $0x50] sm:$0xff]  ;;  %v196_v42 = vld [vmem:[#allocation9 + $0x18] sm:$0xff] }
  0x47   :  { %336 = vmatpush1.bf16.msra.mxu1 %v1530_v19  ;;  %v1535_v37 = vcombine.high %v195_v34, %v199_v35  ;;  %v207_v39 = vld [vmem:[#allocation9 + $0x70] sm:$0xff]  ;;  %v1534_v40 = vcombine.low %v195_v34, %v199_v35  ;;  %v200_v43 = vld [vmem:[#allocation9 + $0x38] sm:$0xff]  ;;  %v1938_v53 = vsub.s32 0, %v1935_v52  ;;  %v1944_v55 = vsub.s32 1, %v1935_v52 }
  0x48   :  { %337 = vmatprep.subr.bf16.mxu1 %v1539_v23  ;;  %v1543_v41 = vcombine.high %v203_v38, %v207_v39  ;;  %v1542_v44 = vcombine.low %v203_v38, %v207_v39  ;;  %v1537_v45 = vcombine.high %v196_v42, %v200_v43  ;;  %v204_v46 = vld [vmem:[#allocation9 + $0x58] sm:$0xff]  ;;  %v1536_v48 = vcombine.low %v196_v42, %v200_v43 }
  0x49   :  { %v208_v47 = vld [vmem:[#allocation9 + $0x78] sm:$0xff]  ;;  %v221_v61 = vsub.s32 2, %v1935_v52  ;;  %v225_v16 = vsub.s32 3, %v1935_v52  ;;  %v229_v25 = vsub.s32 4, %v1935_v52 }
  0x4a   :  { %v1545_v49 = vcombine.high %v204_v46, %v208_v47  ;;  %v1544_v50 = vcombine.low %v204_v46, %v208_v47  ;;  %v209_v54 = vld [vmem:[%s2093_s3] sm:$0xff] }
  0x4b   :  { %338 = vmatpush1.bf16.msra.mxu1 %v1538_v26  ;;  %v214_v56 = vrot.slane %v209_v54, %v1938_v53  ;;  %v218_v57 = vrot.slane %v209_v54, %v1944_v55  ;;  %v222_v20 = vrot.slane %v209_v54, %v221_v61  ;;  %v226_v21 = vrot.slane %v209_v54, %v225_v16 }
  0x4c   :  { %376 = vmatprep.subr.bf16.mxu1 %v1533_v28  ;;  %v233_v28 = vsub.s32 5, %v1935_v52 }
  0x4e   :  { %1546 = vmatmul.mubr.msk.bf16.vlgmr.msra.gmra.mrb[0].mxu1 %vm331_vm0, %v192_v31 }
  0x4f   :  { %377 = vmatpush1.bf16.msra.mxu1 %v1532_v32  ;;  %408 = vmatprep.mubr.bf16.mxu1 %v1770_v22  ;;  %v230_v32 = vrot.slane %v209_v54, %v229_v25 }
  0x50   :  { %378 = vmatprep.subr.bf16.mxu1 %v1541_v33  ;;  %v234_v33 = vrot.slane %v209_v54, %v233_v28 }
  0x53   :  { %379 = vmatpush1.bf16.msra.mxu1 %v1540_v36 }
  0x54   :  { %417 = vmatprep.subr.bf16.mxu1 %v1535_v37  ;;  %v237_v37 = vsub.s32 6, %v1935_v52 }
  0x56   :  { %1547 = vmatmul.mubr.msk.bf16.vlgmr.msra.gmra.mrb[4].mxu1 %vm331_vm0, %v192_v31 }
  0x57   :  { %418 = vmatpush1.bf16.msra.mxu1 %v1534_v40  ;;  %449 = vmatprep.mubr.bf16.mxu1 %v1770_v22  ;;  %v241_v40 = vsub.s32 7, %v1935_v52 }
  0x58   :  { %419 = vmatprep.subr.bf16.mxu1 %v1543_v41 }
  0x5b   :  { %420 = vmatpush1.bf16.msra.mxu1 %v1542_v44  ;;  %v238_v44 = vrot.slane %v209_v54, %v237_v37 }
  0x5c   :  { %458 = vmatprep.subr.bf16.mxu1 %v1537_v45  ;;  %v242_v45 = vrot.slane %v209_v54, %v241_v40 }
  0x5e   :  { %1548 = vmatmul.mubr.msk.bf16.vlgmr.msra.gmra.mrb[8].mxu1 %vm331_vm0, %v192_v31 }
  0x5f   :  { %459 = vmatpush1.bf16.msra.mxu1 %v1536_v48  ;;  %490 = vmatprep.mubr.bf16.mxu1 %v1770_v22 }
  0x60   :  { %460 = vmatprep.subr.bf16.mxu1 %v1545_v49 }
  0x63   :  { %461 = vmatpush1.bf16.msra.mxu1 %v1544_v50 }
  0x66   :  { %1549 = vmatmul.mubr.msk.bf16.vlgmr.msra.gmra.mrb[12].mxu1 %vm331_vm0, %v192_v31 }
 0x121   :  { %v369_v58 = vpop.f32.mrb[0].mxu1 }
 0x122   :  { %v1948_v59 = vadd.f32 %v369_v58, %v214_v56  ;;  %v371_v60 = vpop.f32.mrb[1].mxu1 }
 0x123   :  { %v372_v62 = vadd.f32 %v371_v60, %v218_v57  ;;  %v373_v63 = vpop.f32.mrb[2].mxu1 }
 0x124   :  { %v499_v17 = vmax.f32 %v1948_v59, 0.0  ;;  %v374_v18 = vpop.f32.mrb[3].mxu1 }
 0x125   :  { %v500_v19 = vmax.f32 %v372_v62, 0.0 }
 0x129   :  { %v410_v22 = vpop.f32.mrb[4].mxu1 }
 0x12a   :  { %v1957_v23 = vadd.f32 %v410_v22, %v222_v20  ;;  %v412_v24 = vpop.f32.mrb[5].mxu1 }
 0x12b   :  { %v1960_v26 = vadd.f32 %v412_v24, %v226_v21  ;;  %v414_v27 = vpop.f32.mrb[6].mxu1 }
 0x12c   :  { %v501_v29 = vmax.f32 %v1957_v23, 0.0  ;;  %v415_v30 = vpop.f32.mrb[7].mxu1 }
 0x12d   :  { %v502_v31 = vmax.f32 %v1960_v26, 0.0 }
 0x131   :  { %v451_v34 = vpop.f32.mrb[8].mxu1 }
 0x132   :  { %v1965_v35 = vadd.f32 %v451_v34, %v230_v32  ;;  %v453_v36 = vpop.f32.mrb[9].mxu1 }
 0x133   :  { %v1968_v38 = vadd.f32 %v453_v36, %v234_v33  ;;  %v455_v39 = vpop.f32.mrb[10].mxu1 }
 0x134   :  { %v503_v41 = vmax.f32 %v1965_v35, 0.0  ;;  %v456_v42 = vpop.f32.mrb[11].mxu1 }
 0x135   :  { %v504_v43 = vmax.f32 %v1968_v38, 0.0 }
 0x139   :  { %v492_v46 = vpop.f32.mrb[12].mxu1 }
 0x13a   :  { %v1973_v47 = vadd.f32 %v492_v46, %v238_v44  ;;  %v494_v48 = vpop.f32.mrb[13].mxu1 }
 0x13b   :  { %v1975_v49 = vadd.f32 %v494_v48, %v242_v45  ;;  %v496_v50 = vpop.f32.mrb[14].mxu1 }
 0x13c   :  { %v505_v51 = vmax.f32 %v1973_v47, 0.0  ;;  %v497_v56 = vpop.f32.mrb[15].mxu1 }
 0x13d   :  { %v506_v57 = vmax.f32 %v1975_v49, 0.0 }
 0x13e   :  { %1747 = dma.done.wait [#allocation5], 32768 }
 0x13f   :  { %1748 = vsyncadd [#allocation5], 4294934528  ;;  %v512_v58 = vpack.c.bf16 %v500_v19, %v500_v19  ;;  %v520_v60 = vld [vmem:[#allocation2 + $0x8] sm:$0xff]  ;;  %v522_v62 = vld [vmem:[#allocation2 + $0x18] sm:$0xff] }
 0x140   :  { %v519_v54 = vld [vmem:[#allocation2] sm:$0xff]  ;;  %797 = vmatprep.subr.bf16.mxu0 %v520_v60  ;;  %961 = vmatprep.subr.bf16.mxu1 %v522_v62  ;;  %v521_v63 = vld [vmem:[#allocation2 + $0x10] sm:$0xff]  ;;  %v524_v18 = vld [vmem:[#allocation2 + $0x28] sm:$0xff] }
 0x141   :  { %829 = vmatprep.mubr.bf16.mxu0 %v512_v58  ;;  %993 = vmatprep.mubr.bf16.mxu1 %v512_v58  ;;  %v526_v20 = vld [vmem:[#allocation2 + $0x38] sm:$0xff]  ;;  %v523_v21 = vld [vmem:[#allocation2 + $0x20] sm:$0xff]  ;;  %v525_v22 = vld [vmem:[#allocation2 + $0x30] sm:$0xff] }
 0x142   :  { %798 = vmatpush1.bf16.msra.mxu0 %v519_v54  ;;  %962 = vmatpush1.bf16.msra.mxu1 %v521_v63  ;;  %v528_v24 = vld [vmem:[#allocation2 + $0x48] sm:$0xff]  ;;  %v530_v25 = vld [vmem:[#allocation2 + $0x58] sm:$0xff]  ;;  %v527_v19 = vld [vmem:[#allocation2 + $0x40] sm:$0xff] }
 0x143   :  { %799 = vmatprep.subr.bf16.mxu0 %v524_v18  ;;  %963 = vmatprep.subr.bf16.mxu1 %v526_v20  ;;  %v529_v27 = vld [vmem:[#allocation2 + $0x50] sm:$0xff]  ;;  %v532_v28 = vld [vmem:[#allocation2 + $0x68] sm:$0xff]  ;;  %v534_v30 = vld [vmem:[#allocation2 + $0x78] sm:$0xff] }
 0x144   :  { %v531_v32 = vld [vmem:[#allocation2 + $0x60] sm:$0xff]  ;;  %v533_v33 = vld [vmem:[#allocation2 + $0x70] sm:$0xff]  ;;  %v536_v34 = vld [vmem:[#allocation2 + $0x88] sm:$0xff] }
 0x145   :  { %v538_v36 = vld [vmem:[#allocation2 + $0x98] sm:$0xff]  ;;  %v535_v37 = vld [vmem:[#allocation2 + $0x80] sm:$0xff]  ;;  %v537_v39 = vld [vmem:[#allocation2 + $0x90] sm:$0xff] }
 0x146   :  { %800 = vmatpush1.bf16.msra.mxu0 %v523_v21  ;;  %964 = vmatpush1.bf16.msra.mxu1 %v525_v22  ;;  %v540_v40 = vld [vmem:[#allocation2 + $0xa8] sm:$0xff]  ;;  %v542_v42 = vld [vmem:[#allocation2 + $0xb8] sm:$0xff]  ;;  %v539_v44 = vld [vmem:[#allocation2 + $0xa0] sm:$0xff] }
 0x147   :  { %801 = vmatprep.subr.bf16.mxu0 %v528_v24  ;;  %965 = vmatprep.subr.bf16.mxu1 %v530_v25  ;;  %v541_v45 = vld [vmem:[#allocation2 + $0xb0] sm:$0xff]  ;;  %v544_v46 = vld [vmem:[#allocation2 + $0xc8] sm:$0xff]  ;;  %v546_v48 = vld [vmem:[#allocation2 + $0xd8] sm:$0xff] }
 0x148   :  { %v543_v50 = vld [vmem:[#allocation2 + $0xc0] sm:$0xff]  ;;  %v545_v56 = vld [vmem:[#allocation2 + $0xd0] sm:$0xff]  ;;  %v548_v58 = vld [vmem:[#allocation2 + $0xe8] sm:$0xff] }
 0x149   :  { %v550_v60 = vld [vmem:[#allocation2 + $0xf8] sm:$0xff]  ;;  %v547_v62 = vld [vmem:[#allocation2 + $0xe0] sm:$0xff]  ;;  %v549_v54 = vld [vmem:[#allocation2 + $0xf0] sm:$0xff] }
 0x14a   :  { %802 = vmatpush1.bf16.msra.mxu0 %v527_v19  ;;  %966 = vmatpush1.bf16.msra.mxu1 %v529_v27  ;;  %v552_v63 = vld [vmem:[#allocation2 + $0x108] sm:$0xff]  ;;  %v554_v18 = vld [vmem:[#allocation2 + $0x118] sm:$0xff]  ;;  %v551_v20 = vld [vmem:[#allocation2 + $0x100] sm:$0xff] }
 0x14b   :  { %803 = vmatprep.subr.bf16.mxu0 %v532_v28  ;;  %967 = vmatprep.subr.bf16.mxu1 %v534_v30  ;;  %v553_v21 = vld [vmem:[#allocation2 + $0x110] sm:$0xff]  ;;  %v556_v22 = vld [vmem:[#allocation2 + $0x128] sm:$0xff]  ;;  %v558_v24 = vld [vmem:[#allocation2 + $0x138] sm:$0xff] }
 0x14c   :  { %v555_v25 = vld [vmem:[#allocation2 + $0x120] sm:$0xff]  ;;  %v557_v19 = vld [vmem:[#allocation2 + $0x130] sm:$0xff]  ;;  %v560_v27 = vld [vmem:[#allocation2 + $0x148] sm:$0xff] }
 0x14d   :  { %v562_v28 = vld [vmem:[#allocation2 + $0x158] sm:$0xff]  ;;  %v559_v30 = vld [vmem:[#allocation2 + $0x140] sm:$0xff]  ;;  %v593_v26 = vld [vmem:[#allocation2 + $0x250] sm:$0xff] }
 0x14e   :  { %804 = vmatpush1.bf16.msra.mxu0 %v531_v32  ;;  %968 = vmatpush1.bf16.msra.mxu1 %v533_v33  ;;  %v561_v32 = vld [vmem:[#allocation2 + $0x150] sm:$0xff]  ;;  %v564_v33 = vld [vmem:[#allocation2 + $0x168] sm:$0xff]  ;;  %v587_v59 = vld [vmem:[#allocation2 + $0x220] sm:$0xff] }
 0x14f   :  { %805 = vmatprep.subr.bf16.mxu0 %v536_v34  ;;  %969 = vmatprep.subr.bf16.mxu1 %v538_v36  ;;  %v566_v34 = vld [vmem:[#allocation2 + $0x178] sm:$0xff]  ;;  %v563_v36 = vld [vmem:[#allocation2 + $0x160] sm:$0xff]  ;;  %v657_v38 = vld [vmem:[#allocation2 + $0x450] sm:$0xff] }
 0x150   :  { %v651_v23 = vld [vmem:[#allocation2 + $0x420] sm:$0xff]  ;;  %v721_v49 = vld [vmem:[#allocation2 + $0x650] sm:$0xff] }
 0x151   :  { %v715_v35 = vld [vmem:[#allocation2 + $0x620] sm:$0xff] }
 0x152   :  { %806 = vmatpush1.bf16.msra.mxu0 %v535_v37  ;;  %970 = vmatpush1.bf16.msra.mxu1 %v537_v39  ;;  %v565_v37 = vld [vmem:[#allocation2 + $0x170] sm:$0xff]  ;;  %v568_v39 = vld [vmem:[#allocation2 + $0x188] sm:$0xff] }
 0x153   :  { %807 = vmatprep.subr.bf16.mxu0 %v540_v40  ;;  %971 = vmatprep.subr.bf16.mxu1 %v542_v42  ;;  %v570_v40 = vld [vmem:[#allocation2 + $0x198] sm:$0xff]  ;;  %v567_v42 = vld [vmem:[#allocation2 + $0x180] sm:$0xff] }
 0x156   :  { %808 = vmatpush1.bf16.msra.mxu0 %v539_v44  ;;  %972 = vmatpush1.bf16.msra.mxu1 %v541_v45  ;;  %v569_v44 = vld [vmem:[#allocation2 + $0x190] sm:$0xff]  ;;  %v572_v45 = vld [vmem:[#allocation2 + $0x1a8] sm:$0xff] }
 0x157   :  { %809 = vmatprep.subr.bf16.mxu0 %v544_v46  ;;  %973 = vmatprep.subr.bf16.mxu1 %v546_v48  ;;  %v574_v46 = vld [vmem:[#allocation2 + $0x1b8] sm:$0xff]  ;;  %v571_v48 = vld [vmem:[#allocation2 + $0x1a0] sm:$0xff] }
 0x15a   :  { %810 = vmatpush1.bf16.msra.mxu0 %v543_v50  ;;  %974 = vmatpush1.bf16.msra.mxu1 %v545_v56  ;;  %v573_v50 = vld [vmem:[#allocation2 + $0x1b0] sm:$0xff]  ;;  %v576_v56 = vld [vmem:[#allocation2 + $0x1c8] sm:$0xff] }
 0x15b   :  { %811 = vmatprep.subr.bf16.mxu0 %v548_v58  ;;  %975 = vmatprep.subr.bf16.mxu1 %v550_v60  ;;  %v578_v58 = vld [vmem:[#allocation2 + $0x1d8] sm:$0xff]  ;;  %v575_v60 = vld [vmem:[#allocation2 + $0x1c0] sm:$0xff] }
 0x15e   :  { %812 = vmatpush1.bf16.msra.mxu0 %v547_v62  ;;  %976 = vmatpush1.bf16.msra.mxu1 %v549_v54  ;;  %v577_v62 = vld [vmem:[#allocation2 + $0x1d0] sm:$0xff]  ;;  %v580_v54 = vld [vmem:[#allocation2 + $0x1e8] sm:$0xff] }
 0x15f   :  { %813 = vmatprep.subr.bf16.mxu0 %v552_v63  ;;  %977 = vmatprep.subr.bf16.mxu1 %v554_v18  ;;  %v582_v63 = vld [vmem:[#allocation2 + $0x1f8] sm:$0xff]  ;;  %v579_v18 = vld [vmem:[#allocation2 + $0x1e0] sm:$0xff] }
 0x162   :  { %814 = vmatpush1.bf16.msra.mxu0 %v551_v20  ;;  %978 = vmatpush1.bf16.msra.mxu1 %v553_v21  ;;  %v581_v20 = vld [vmem:[#allocation2 + $0x1f0] sm:$0xff]  ;;  %v584_v21 = vld [vmem:[#allocation2 + $0x208] sm:$0xff] }
 0x163   :  { %815 = vmatprep.subr.bf16.mxu0 %v556_v22  ;;  %979 = vmatprep.subr.bf16.mxu1 %v558_v24  ;;  %v586_v22 = vld [vmem:[#allocation2 + $0x218] sm:$0xff]  ;;  %v511_v24 = vpack.c.bf16 %v499_v17, %v499_v17  ;;  %v589_v17 = vld [vmem:[#allocation2 + $0x230] sm:$0xff] }
 0x166   :  { %816 = vmatpush1.bf16.msra.mxu0 %v555_v25  ;;  %980 = vmatpush1.bf16.msra.mxu1 %v557_v19  ;;  %v583_v25 = vld [vmem:[#allocation2 + $0x200] sm:$0xff]  ;;  %v585_v19 = vld [vmem:[#allocation2 + $0x210] sm:$0xff] }
 0x167   :  { %817 = vmatprep.subr.bf16.mxu0 %v560_v27  ;;  %981 = vmatprep.subr.bf16.mxu1 %v562_v28  ;;  %v588_v27 = vld [vmem:[#allocation2 + $0x228] sm:$0xff]  ;;  %v590_v28 = vld [vmem:[#allocation2 + $0x238] sm:$0xff] }
 0x16a   :  { %818 = vmatpush1.bf16.msra.mxu0 %v559_v30  ;;  %982 = vmatpush1.bf16.msra.mxu1 %v561_v32  ;;  %v514_v30 = vpack.c.bf16 %v502_v31, %v502_v31  ;;  %v592_v32 = vld [vmem:[#allocation2 + $0x248] sm:$0xff]  ;;  %v598_v31 = vld [vmem:[#allocation2 + $0x278] sm:$0xff] }
 0x16b   :  { %819 = vmatprep.subr.bf16.mxu0 %v564_v33  ;;  %983 = vmatprep.subr.bf16.mxu1 %v566_v34  ;;  %v594_v33 = vld [vmem:[#allocation2 + $0x258] sm:$0xff]  ;;  %v591_v34 = vld [vmem:[#allocation2 + $0x240] sm:$0xff] }
 0x16e   :  { %820 = vmatpush1.bf16.msra.mxu0 %v563_v36  ;;  %984 = vmatpush1.bf16.msra.mxu1 %v565_v37  ;;  %v596_v36 = vld [vmem:[#allocation2 + $0x268] sm:$0xff]  ;;  %v595_v37 = vld [vmem:[#allocation2 + $0x260] sm:$0xff] }
 0x16f   :  { %821 = vmatprep.subr.bf16.mxu0 %v568_v39  ;;  %985 = vmatprep.subr.bf16.mxu1 %v570_v40  ;;  %v597_v39 = vld [vmem:[#allocation2 + $0x270] sm:$0xff]  ;;  %v600_v40 = vld [vmem:[#allocation2 + $0x288] sm:$0xff] }
 0x172   :  { %822 = vmatpush1.bf16.msra.mxu0 %v567_v42  ;;  %986 = vmatpush1.bf16.msra.mxu1 %v569_v44  ;;  %v602_v42 = vld [vmem:[#allocation2 + $0x298] sm:$0xff]  ;;  %v599_v44 = vld [vmem:[#allocation2 + $0x280] sm:$0xff] }
 0x173   :  { %823 = vmatprep.subr.bf16.mxu0 %v572_v45  ;;  %987 = vmatprep.subr.bf16.mxu1 %v574_v46  ;;  %v601_v45 = vld [vmem:[#allocation2 + $0x290] sm:$0xff]  ;;  %v604_v46 = vld [vmem:[#allocation2 + $0x2a8] sm:$0xff] }
 0x176   :  { %824 = vmatpush1.bf16.msra.mxu0 %v571_v48  ;;  %988 = vmatpush1.bf16.msra.mxu1 %v573_v50  ;;  %v606_v48 = vld [vmem:[#allocation2 + $0x2b8] sm:$0xff]  ;;  %v603_v50 = vld [vmem:[#allocation2 + $0x2a0] sm:$0xff] }
 0x177   :  { %825 = vmatprep.subr.bf16.mxu0 %v576_v56  ;;  %989 = vmatprep.subr.bf16.mxu1 %v578_v58  ;;  %v605_v56 = vld [vmem:[#allocation2 + $0x2b0] sm:$0xff]  ;;  %v608_v58 = vld [vmem:[#allocation2 + $0x2c8] sm:$0xff] }
 0x17a   :  { %826 = vmatpush1.bf16.msra.mxu0 %v575_v60  ;;  %990 = vmatpush1.bf16.msra.mxu1 %v577_v62  ;;  %v610_v60 = vld [vmem:[#allocation2 + $0x2d8] sm:$0xff]  ;;  %v607_v62 = vld [vmem:[#allocation2 + $0x2c0] sm:$0xff] }
 0x17b   :  { %827 = vmatprep.subr.bf16.mxu0 %v580_v54  ;;  %991 = vmatprep.subr.bf16.mxu1 %v582_v63  ;;  %v609_v54 = vld [vmem:[#allocation2 + $0x2d0] sm:$0xff]  ;;  %v612_v63 = vld [vmem:[#allocation2 + $0x2e8] sm:$0xff] }
 0x17e   :  { %828 = vmatpush1.bf16.msra.mxu0 %v579_v18  ;;  %992 = vmatpush1.bf16.msra.mxu1 %v581_v20  ;;  %v614_v18 = vld [vmem:[#allocation2 + $0x2f8] sm:$0xff]  ;;  %v611_v20 = vld [vmem:[#allocation2 + $0x2e0] sm:$0xff] }
 0x17f   :  { %838 = vmatprep.subr.bf16.mxu0 %v584_v21  ;;  %1002 = vmatprep.subr.bf16.mxu1 %v586_v22  ;;  %v613_v21 = vld [vmem:[#allocation2 + $0x2f0] sm:$0xff]  ;;  %v616_v22 = vld [vmem:[#allocation2 + $0x308] sm:$0xff] }
 0x181   :  { %830 = vmatmul.mubr.bf16.vlgmr.msra.gmra.mrb[0].mxu0 %v511_v24  ;;  %994 = vmatmul.mubr.bf16.vlgmr.msra.gmra.mrb[16].mxu1 %v511_v24  ;;  %v618_v24 = vld [vmem:[#allocation2 + $0x318] sm:$0xff] }
 0x182   :  { %839 = vmatpush1.bf16.msra.mxu0 %v583_v25  ;;  %1003 = vmatpush1.bf16.msra.mxu1 %v585_v19  ;;  %v615_v25 = vld [vmem:[#allocation2 + $0x300] sm:$0xff]  ;;  %v617_v19 = vld [vmem:[#allocation2 + $0x310] sm:$0xff] }
 0x183   :  { %840 = vmatprep.subr.bf16.mxu0 %v588_v27  ;;  %1004 = vmatprep.subr.bf16.mxu1 %v590_v28  ;;  %v620_v27 = vld [vmem:[#allocation2 + $0x328] sm:$0xff]  ;;  %v622_v28 = vld [vmem:[#allocation2 + $0x338] sm:$0xff] }
 0x184   :  { %870 = vmatprep.mubr.bf16.mxu0 %v514_v30  ;;  %1034 = vmatprep.mubr.bf16.mxu1 %v514_v30  ;;  %v619_v30 = vld [vmem:[#allocation2 + $0x320] sm:$0xff] }
 0x186   :  { %841 = vmatpush1.bf16.msra.mxu0 %v587_v59  ;;  %1005 = vmatpush1.bf16.msra.mxu1 %v589_v17  ;;  %v621_v59 = vld [vmem:[#allocation2 + $0x330] sm:$0xff]  ;;  %v624_v17 = vld [vmem:[#allocation2 + $0x348] sm:$0xff] }
 0x187   :  { %842 = vmatprep.subr.bf16.mxu0 %v592_v32  ;;  %1006 = vmatprep.subr.bf16.mxu1 %v594_v33  ;;  %v626_v32 = vld [vmem:[#allocation2 + $0x358] sm:$0xff]  ;;  %v623_v33 = vld [vmem:[#allocation2 + $0x340] sm:$0xff] }
 0x18a   :  { %843 = vmatpush1.bf16.msra.mxu0 %v591_v34  ;;  %1007 = vmatpush1.bf16.msra.mxu1 %v593_v26  ;;  %v625_v34 = vld [vmem:[#allocation2 + $0x350] sm:$0xff]  ;;  %v628_v26 = vld [vmem:[#allocation2 + $0x368] sm:$0xff] }
 0x18b   :  { %844 = vmatprep.subr.bf16.mxu0 %v596_v36  ;;  %1008 = vmatprep.subr.bf16.mxu1 %v598_v31  ;;  %v630_v36 = vld [vmem:[#allocation2 + $0x378] sm:$0xff]  ;;  %v627_v31 = vld [vmem:[#allocation2 + $0x360] sm:$0xff] }
 0x18e   :  { %845 = vmatpush1.bf16.msra.mxu0 %v595_v37  ;;  %1009 = vmatpush1.bf16.msra.mxu1 %v597_v39  ;;  %v629_v37 = vld [vmem:[#allocation2 + $0x370] sm:$0xff]  ;;  %v632_v39 = vld [vmem:[#allocation2 + $0x388] sm:$0xff] }
 0x18f   :  { %846 = vmatprep.subr.bf16.mxu0 %v600_v40  ;;  %1010 = vmatprep.subr.bf16.mxu1 %v602_v42  ;;  %v634_v40 = vld [vmem:[#allocation2 + $0x398] sm:$0xff]  ;;  %v631_v42 = vld [vmem:[#allocation2 + $0x380] sm:$0xff] }
 0x192   :  { %847 = vmatpush1.bf16.msra.mxu0 %v599_v44  ;;  %1011 = vmatpush1.bf16.msra.mxu1 %v601_v45  ;;  %v633_v44 = vld [vmem:[#allocation2 + $0x390] sm:$0xff]  ;;  %v636_v45 = vld [vmem:[#allocation2 + $0x3a8] sm:$0xff] }
 0x193   :  { %848 = vmatprep.subr.bf16.mxu0 %v604_v46  ;;  %1012 = vmatprep.subr.bf16.mxu1 %v606_v48  ;;  %v638_v46 = vld [vmem:[#allocation2 + $0x3b8] sm:$0xff]  ;;  %v635_v48 = vld [vmem:[#allocation2 + $0x3a0] sm:$0xff] }
 0x196   :  { %849 = vmatpush1.bf16.msra.mxu0 %v603_v50  ;;  %1013 = vmatpush1.bf16.msra.mxu1 %v605_v56  ;;  %v637_v50 = vld [vmem:[#allocation2 + $0x3b0] sm:$0xff]  ;;  %v640_v56 = vld [vmem:[#allocation2 + $0x3c8] sm:$0xff] }
 0x197   :  { %850 = vmatprep.subr.bf16.mxu0 %v608_v58  ;;  %1014 = vmatprep.subr.bf16.mxu1 %v610_v60  ;;  %v642_v58 = vld [vmem:[#allocation2 + $0x3d8] sm:$0xff]  ;;  %v639_v60 = vld [vmem:[#allocation2 + $0x3c0] sm:$0xff] }
 0x19a   :  { %851 = vmatpush1.bf16.msra.mxu0 %v607_v62  ;;  %1015 = vmatpush1.bf16.msra.mxu1 %v609_v54  ;;  %v641_v62 = vld [vmem:[#allocation2 + $0x3d0] sm:$0xff]  ;;  %v644_v54 = vld [vmem:[#allocation2 + $0x3e8] sm:$0xff] }
 0x19b   :  { %852 = vmatprep.subr.bf16.mxu0 %v612_v63  ;;  %1016 = vmatprep.subr.bf16.mxu1 %v614_v18  ;;  %v646_v63 = vld [vmem:[#allocation2 + $0x3f8] sm:$0xff]  ;;  %v643_v18 = vld [vmem:[#allocation2 + $0x3e0] sm:$0xff] }
 0x19e   :  { %853 = vmatpush1.bf16.msra.mxu0 %v611_v20  ;;  %1017 = vmatpush1.bf16.msra.mxu1 %v613_v21  ;;  %v645_v20 = vld [vmem:[#allocation2 + $0x3f0] sm:$0xff]  ;;  %v648_v21 = vld [vmem:[#allocation2 + $0x408] sm:$0xff] }
 0x19f   :  { %854 = vmatprep.subr.bf16.mxu0 %v616_v22  ;;  %1018 = vmatprep.subr.bf16.mxu1 %v618_v24  ;;  %v650_v22 = vld [vmem:[#allocation2 + $0x418] sm:$0xff]  ;;  %v513_v24 = vpack.c.bf16 %v501_v29, %v501_v29  ;;  %v653_v29 = vld [vmem:[#allocation2 + $0x430] sm:$0xff] }
 0x1a2   :  { %855 = vmatpush1.bf16.msra.mxu0 %v615_v25  ;;  %1019 = vmatpush1.bf16.msra.mxu1 %v617_v19  ;;  %v647_v25 = vld [vmem:[#allocation2 + $0x400] sm:$0xff]  ;;  %v649_v19 = vld [vmem:[#allocation2 + $0x410] sm:$0xff] }
 0x1a3   :  { %856 = vmatprep.subr.bf16.mxu0 %v620_v27  ;;  %1020 = vmatprep.subr.bf16.mxu1 %v622_v28  ;;  %v652_v27 = vld [vmem:[#allocation2 + $0x428] sm:$0xff]  ;;  %v654_v28 = vld [vmem:[#allocation2 + $0x438] sm:$0xff] }
 0x1a6   :  { %857 = vmatpush1.bf16.msra.mxu0 %v619_v30  ;;  %1021 = vmatpush1.bf16.msra.mxu1 %v621_v59  ;;  %v516_v30 = vpack.c.bf16 %v504_v43, %v504_v43  ;;  %v656_v59 = vld [vmem:[#allocation2 + $0x448] sm:$0xff]  ;;  %v662_v43 = vld [vmem:[#allocation2 + $0x478] sm:$0xff] }
 0x1a7   :  { %858 = vmatprep.subr.bf16.mxu0 %v624_v17  ;;  %1022 = vmatprep.subr.bf16.mxu1 %v626_v32  ;;  %v658_v17 = vld [vmem:[#allocation2 + $0x458] sm:$0xff]  ;;  %v655_v32 = vld [vmem:[#allocation2 + $0x440] sm:$0xff] }
 0x1aa   :  { %859 = vmatpush1.bf16.msra.mxu0 %v623_v33  ;;  %1023 = vmatpush1.bf16.msra.mxu1 %v625_v34  ;;  %v660_v33 = vld [vmem:[#allocation2 + $0x468] sm:$0xff]  ;;  %v659_v34 = vld [vmem:[#allocation2 + $0x460] sm:$0xff] }
 0x1ab   :  { %860 = vmatprep.subr.bf16.mxu0 %v628_v26  ;;  %1024 = vmatprep.subr.bf16.mxu1 %v630_v36  ;;  %v661_v26 = vld [vmem:[#allocation2 + $0x470] sm:$0xff]  ;;  %v664_v36 = vld [vmem:[#allocation2 + $0x488] sm:$0xff] }
 0x1ae   :  { %861 = vmatpush1.bf16.msra.mxu0 %v627_v31  ;;  %1025 = vmatpush1.bf16.msra.mxu1 %v629_v37  ;;  %v666_v31 = vld [vmem:[#allocation2 + $0x498] sm:$0xff]  ;;  %v663_v37 = vld [vmem:[#allocation2 + $0x480] sm:$0xff] }
 0x1af   :  { %862 = vmatprep.subr.bf16.mxu0 %v632_v39  ;;  %1026 = vmatprep.subr.bf16.mxu1 %v634_v40  ;;  %v665_v39 = vld [vmem:[#allocation2 + $0x490] sm:$0xff]  ;;  %v668_v40 = vld [vmem:[#allocation2 + $0x4a8] sm:$0xff] }
 0x1b2   :  { %863 = vmatpush1.bf16.msra.mxu0 %v631_v42  ;;  %1027 = vmatpush1.bf16.msra.mxu1 %v633_v44  ;;  %v670_v42 = vld [vmem:[#allocation2 + $0x4b8] sm:$0xff]  ;;  %v667_v44 = vld [vmem:[#allocation2 + $0x4a0] sm:$0xff] }
 0x1b3   :  { %864 = vmatprep.subr.bf16.mxu0 %v636_v45  ;;  %1028 = vmatprep.subr.bf16.mxu1 %v638_v46  ;;  %v669_v45 = vld [vmem:[#allocation2 + $0x4b0] sm:$0xff]  ;;  %v672_v46 = vld [vmem:[#allocation2 + $0x4c8] sm:$0xff] }
 0x1b6   :  { %865 = vmatpush1.bf16.msra.mxu0 %v635_v48  ;;  %1029 = vmatpush1.bf16.msra.mxu1 %v637_v50  ;;  %v674_v48 = vld [vmem:[#allocation2 + $0x4d8] sm:$0xff]  ;;  %v671_v50 = vld [vmem:[#allocation2 + $0x4c0] sm:$0xff] }
 0x1b7   :  { %866 = vmatprep.subr.bf16.mxu0 %v640_v56  ;;  %1030 = vmatprep.subr.bf16.mxu1 %v642_v58  ;;  %v673_v56 = vld [vmem:[#allocation2 + $0x4d0] sm:$0xff]  ;;  %v676_v58 = vld [vmem:[#allocation2 + $0x4e8] sm:$0xff] }
 0x1ba   :  { %867 = vmatpush1.bf16.msra.mxu0 %v639_v60  ;;  %1031 = vmatpush1.bf16.msra.mxu1 %v641_v62  ;;  %v678_v60 = vld [vmem:[#allocation2 + $0x4f8] sm:$0xff]  ;;  %v675_v62 = vld [vmem:[#allocation2 + $0x4e0] sm:$0xff] }
 0x1bb   :  { %868 = vmatprep.subr.bf16.mxu0 %v644_v54  ;;  %1032 = vmatprep.subr.bf16.mxu1 %v646_v63  ;;  %v677_v54 = vld [vmem:[#allocation2 + $0x4f0] sm:$0xff]  ;;  %v680_v63 = vld [vmem:[#allocation2 + $0x508] sm:$0xff] }
 0x1be   :  { %869 = vmatpush1.bf16.msra.mxu0 %v643_v18  ;;  %1033 = vmatpush1.bf16.msra.mxu1 %v645_v20  ;;  %v682_v18 = vld [vmem:[#allocation2 + $0x518] sm:$0xff]  ;;  %v679_v20 = vld [vmem:[#allocation2 + $0x500] sm:$0xff] }
 0x1bf   :  { %879 = vmatprep.subr.bf16.mxu0 %v648_v21  ;;  %1043 = vmatprep.subr.bf16.mxu1 %v650_v22  ;;  %v681_v21 = vld [vmem:[#allocation2 + $0x510] sm:$0xff]  ;;  %v684_v22 = vld [vmem:[#allocation2 + $0x528] sm:$0xff] }
 0x1c1   :  { %871 = vmatmul.mubr.bf16.vlgmr.msra.gmra.mrb[0].mxu0 %v513_v24  ;;  %1035 = vmatmul.mubr.bf16.vlgmr.msra.gmra.mrb[16].mxu1 %v513_v24  ;;  %v686_v24 = vld [vmem:[#allocation2 + $0x538] sm:$0xff] }
 0x1c2   :  { %880 = vmatpush1.bf16.msra.mxu0 %v647_v25  ;;  %1044 = vmatpush1.bf16.msra.mxu1 %v649_v19  ;;  %v683_v25 = vld [vmem:[#allocation2 + $0x520] sm:$0xff]  ;;  %v685_v19 = vld [vmem:[#allocation2 + $0x530] sm:$0xff] }
 0x1c3   :  { %881 = vmatprep.subr.bf16.mxu0 %v652_v27  ;;  %1045 = vmatprep.subr.bf16.mxu1 %v654_v28  ;;  %v688_v27 = vld [vmem:[#allocation2 + $0x548] sm:$0xff]  ;;  %v690_v28 = vld [vmem:[#allocation2 + $0x558] sm:$0xff] }
 0x1c4   :  { %911 = vmatprep.mubr.bf16.mxu0 %v516_v30  ;;  %1075 = vmatprep.mubr.bf16.mxu1 %v516_v30  ;;  %v687_v30 = vld [vmem:[#allocation2 + $0x540] sm:$0xff] }
 0x1c6   :  { %882 = vmatpush1.bf16.msra.mxu0 %v651_v23  ;;  %1046 = vmatpush1.bf16.msra.mxu1 %v653_v29  ;;  %v689_v23 = vld [vmem:[#allocation2 + $0x550] sm:$0xff]  ;;  %v692_v29 = vld [vmem:[#allocation2 + $0x568] sm:$0xff] }
 0x1c7   :  { %883 = vmatprep.subr.bf16.mxu0 %v656_v59  ;;  %1047 = vmatprep.subr.bf16.mxu1 %v658_v17  ;;  %v694_v59 = vld [vmem:[#allocation2 + $0x578] sm:$0xff]  ;;  %v691_v17 = vld [vmem:[#allocation2 + $0x560] sm:$0xff] }
 0x1ca   :  { %884 = vmatpush1.bf16.msra.mxu0 %v655_v32  ;;  %1048 = vmatpush1.bf16.msra.mxu1 %v657_v38  ;;  %v693_v32 = vld [vmem:[#allocation2 + $0x570] sm:$0xff]  ;;  %v696_v38 = vld [vmem:[#allocation2 + $0x588] sm:$0xff] }
 0x1cb   :  { %885 = vmatprep.subr.bf16.mxu0 %v660_v33  ;;  %1049 = vmatprep.subr.bf16.mxu1 %v662_v43  ;;  %v698_v33 = vld [vmem:[#allocation2 + $0x598] sm:$0xff]  ;;  %v695_v43 = vld [vmem:[#allocation2 + $0x580] sm:$0xff] }
 0x1ce   :  { %886 = vmatpush1.bf16.msra.mxu0 %v659_v34  ;;  %1050 = vmatpush1.bf16.msra.mxu1 %v661_v26  ;;  %v697_v34 = vld [vmem:[#allocation2 + $0x590] sm:$0xff]  ;;  %v700_v26 = vld [vmem:[#allocation2 + $0x5a8] sm:$0xff] }
 0x1cf   :  { %887 = vmatprep.subr.bf16.mxu0 %v664_v36  ;;  %1051 = vmatprep.subr.bf16.mxu1 %v666_v31  ;;  %v702_v36 = vld [vmem:[#allocation2 + $0x5b8] sm:$0xff]  ;;  %v699_v31 = vld [vmem:[#allocation2 + $0x5a0] sm:$0xff] }
 0x1d2   :  { %888 = vmatpush1.bf16.msra.mxu0 %v663_v37  ;;  %1052 = vmatpush1.bf16.msra.mxu1 %v665_v39  ;;  %v701_v37 = vld [vmem:[#allocation2 + $0x5b0] sm:$0xff]  ;;  %v704_v39 = vld [vmem:[#allocation2 + $0x5c8] sm:$0xff] }
 0x1d3   :  { %889 = vmatprep.subr.bf16.mxu0 %v668_v40  ;;  %1053 = vmatprep.subr.bf16.mxu1 %v670_v42  ;;  %v706_v40 = vld [vmem:[#allocation2 + $0x5d8] sm:$0xff]  ;;  %v703_v42 = vld [vmem:[#allocation2 + $0x5c0] sm:$0xff] }
 0x1d6   :  { %890 = vmatpush1.bf16.msra.mxu0 %v667_v44  ;;  %1054 = vmatpush1.bf16.msra.mxu1 %v669_v45  ;;  %v705_v44 = vld [vmem:[#allocation2 + $0x5d0] sm:$0xff]  ;;  %v708_v45 = vld [vmem:[#allocation2 + $0x5e8] sm:$0xff] }
 0x1d7   :  { %891 = vmatprep.subr.bf16.mxu0 %v672_v46  ;;  %1055 = vmatprep.subr.bf16.mxu1 %v674_v48  ;;  %v710_v46 = vld [vmem:[#allocation2 + $0x5f8] sm:$0xff]  ;;  %v707_v48 = vld [vmem:[#allocation2 + $0x5e0] sm:$0xff] }
 0x1da   :  { %892 = vmatpush1.bf16.msra.mxu0 %v671_v50  ;;  %1056 = vmatpush1.bf16.msra.mxu1 %v673_v56  ;;  %v709_v50 = vld [vmem:[#allocation2 + $0x5f0] sm:$0xff]  ;;  %v712_v56 = vld [vmem:[#allocation2 + $0x608] sm:$0xff] }
 0x1db   :  { %893 = vmatprep.subr.bf16.mxu0 %v676_v58  ;;  %1057 = vmatprep.subr.bf16.mxu1 %v678_v60  ;;  %v714_v58 = vld [vmem:[#allocation2 + $0x618] sm:$0xff]  ;;  %v515_v60 = vpack.c.bf16 %v503_v41, %v503_v41  ;;  %v717_v41 = vld [vmem:[#allocation2 + $0x630] sm:$0xff] }
 0x1de   :  { %894 = vmatpush1.bf16.msra.mxu0 %v675_v62  ;;  %1058 = vmatpush1.bf16.msra.mxu1 %v677_v54  ;;  %v711_v62 = vld [vmem:[#allocation2 + $0x600] sm:$0xff]  ;;  %v713_v54 = vld [vmem:[#allocation2 + $0x610] sm:$0xff] }
 0x1df   :  { %895 = vmatprep.subr.bf16.mxu0 %v680_v63  ;;  %1059 = vmatprep.subr.bf16.mxu1 %v682_v18  ;;  %v716_v63 = vld [vmem:[#allocation2 + $0x628] sm:$0xff]  ;;  %v718_v18 = vld [vmem:[#allocation2 + $0x638] sm:$0xff] }
 0x1e2   :  { %896 = vmatpush1.bf16.msra.mxu0 %v679_v20  ;;  %1060 = vmatpush1.bf16.msra.mxu1 %v681_v21  ;;  %v518_v20 = vpack.c.bf16 %v506_v57, %v506_v57  ;;  %v720_v21 = vld [vmem:[#allocation2 + $0x648] sm:$0xff]  ;;  %v726_v57 = vld [vmem:[#allocation2 + $0x678] sm:$0xff] }
 0x1e3   :  { %897 = vmatprep.subr.bf16.mxu0 %v684_v22  ;;  %1061 = vmatprep.subr.bf16.mxu1 %v686_v24  ;;  %v722_v22 = vld [vmem:[#allocation2 + $0x658] sm:$0xff]  ;;  %v719_v24 = vld [vmem:[#allocation2 + $0x640] sm:$0xff] }
 0x1e6   :  { %898 = vmatpush1.bf16.msra.mxu0 %v683_v25  ;;  %1062 = vmatpush1.bf16.msra.mxu1 %v685_v19  ;;  %v724_v25 = vld [vmem:[#allocation2 + $0x668] sm:$0xff]  ;;  %v723_v19 = vld [vmem:[#allocation2 + $0x660] sm:$0xff] }
 0x1e7   :  { %899 = vmatprep.subr.bf16.mxu0 %v688_v27  ;;  %1063 = vmatprep.subr.bf16.mxu1 %v690_v28  ;;  %v725_v27 = vld [vmem:[#allocation2 + $0x670] sm:$0xff]  ;;  %v728_v28 = vld [vmem:[#allocation2 + $0x688] sm:$0xff] }
 0x1ea   :  { %900 = vmatpush1.bf16.msra.mxu0 %v687_v30  ;;  %1064 = vmatpush1.bf16.msra.mxu1 %v689_v23  ;;  %v730_v30 = vld [vmem:[#allocation2 + $0x698] sm:$0xff]  ;;  %v727_v23 = vld [vmem:[#allocation2 + $0x680] sm:$0xff] }
 0x1eb   :  { %901 = vmatprep.subr.bf16.mxu0 %v692_v29  ;;  %1065 = vmatprep.subr.bf16.mxu1 %v694_v59  ;;  %v729_v29 = vld [vmem:[#allocation2 + $0x690] sm:$0xff]  ;;  %v732_v59 = vld [vmem:[#allocation2 + $0x6a8] sm:$0xff] }
 0x1ee   :  { %902 = vmatpush1.bf16.msra.mxu0 %v691_v17  ;;  %1066 = vmatpush1.bf16.msra.mxu1 %v693_v32  ;;  %v734_v17 = vld [vmem:[#allocation2 + $0x6b8] sm:$0xff]  ;;  %v731_v32 = vld [vmem:[#allocation2 + $0x6a0] sm:$0xff] }
 0x1ef   :  { %903 = vmatprep.subr.bf16.mxu0 %v696_v38  ;;  %1067 = vmatprep.subr.bf16.mxu1 %v698_v33  ;;  %v733_v38 = vld [vmem:[#allocation2 + $0x6b0] sm:$0xff]  ;;  %v736_v33 = vld [vmem:[#allocation2 + $0x6c8] sm:$0xff] }
 0x1f2   :  { %904 = vmatpush1.bf16.msra.mxu0 %v695_v43  ;;  %1068 = vmatpush1.bf16.msra.mxu1 %v697_v34  ;;  %v738_v43 = vld [vmem:[#allocation2 + $0x6d8] sm:$0xff]  ;;  %v735_v34 = vld [vmem:[#allocation2 + $0x6c0] sm:$0xff] }
 0x1f3   :  { %905 = vmatprep.subr.bf16.mxu0 %v700_v26  ;;  %1069 = vmatprep.subr.bf16.mxu1 %v702_v36  ;;  %v737_v26 = vld [vmem:[#allocation2 + $0x6d0] sm:$0xff]  ;;  %v740_v36 = vld [vmem:[#allocation2 + $0x6e8] sm:$0xff] }
 0x1f6   :  { %906 = vmatpush1.bf16.msra.mxu0 %v699_v31  ;;  %1070 = vmatpush1.bf16.msra.mxu1 %v701_v37  ;;  %v742_v31 = vld [vmem:[#allocation2 + $0x6f8] sm:$0xff]  ;;  %v739_v37 = vld [vmem:[#allocation2 + $0x6e0] sm:$0xff] }
 0x1f7   :  { %907 = vmatprep.subr.bf16.mxu0 %v704_v39  ;;  %1071 = vmatprep.subr.bf16.mxu1 %v706_v40  ;;  %v741_v39 = vld [vmem:[#allocation2 + $0x6f0] sm:$0xff]  ;;  %v744_v40 = vld [vmem:[#allocation2 + $0x708] sm:$0xff] }
 0x1fa   :  { %908 = vmatpush1.bf16.msra.mxu0 %v703_v42  ;;  %1072 = vmatpush1.bf16.msra.mxu1 %v705_v44  ;;  %v746_v42 = vld [vmem:[#allocation2 + $0x718] sm:$0xff]  ;;  %v743_v44 = vld [vmem:[#allocation2 + $0x700] sm:$0xff] }
 0x1fb   :  { %909 = vmatprep.subr.bf16.mxu0 %v708_v45  ;;  %1073 = vmatprep.subr.bf16.mxu1 %v710_v46  ;;  %v745_v45 = vld [vmem:[#allocation2 + $0x710] sm:$0xff]  ;;  %v748_v46 = vld [vmem:[#allocation2 + $0x728] sm:$0xff] }
 0x1fe   :  { %910 = vmatpush1.bf16.msra.mxu0 %v707_v48  ;;  %1074 = vmatpush1.bf16.msra.mxu1 %v709_v50  ;;  %v750_v48 = vld [vmem:[#allocation2 + $0x738] sm:$0xff]  ;;  %v747_v50 = vld [vmem:[#allocation2 + $0x720] sm:$0xff] }
 0x1ff   :  { %920 = vmatprep.subr.bf16.mxu0 %v712_v56  ;;  %1084 = vmatprep.subr.bf16.mxu1 %v714_v58  ;;  %v749_v56 = vld [vmem:[#allocation2 + $0x730] sm:$0xff]  ;;  %v752_v58 = vld [vmem:[#allocation2 + $0x748] sm:$0xff] }
 0x201   :  { %912 = vmatmul.mubr.bf16.vlgmr.msra.gmra.mrb[0].mxu0 %v515_v60  ;;  %1076 = vmatmul.mubr.bf16.vlgmr.msra.gmra.mrb[16].mxu1 %v515_v60  ;;  %v754_v60 = vld [vmem:[#allocation2 + $0x758] sm:$0xff] }
 0x202   :  { %921 = vmatpush1.bf16.msra.mxu0 %v711_v62  ;;  %1085 = vmatpush1.bf16.msra.mxu1 %v713_v54  ;;  %v751_v62 = vld [vmem:[#allocation2 + $0x740] sm:$0xff]  ;;  %v753_v54 = vld [vmem:[#allocation2 + $0x750] sm:$0xff] }
 0x203   :  { %922 = vmatprep.subr.bf16.mxu0 %v716_v63  ;;  %1086 = vmatprep.subr.bf16.mxu1 %v718_v18  ;;  %v756_v63 = vld [vmem:[#allocation2 + $0x768] sm:$0xff]  ;;  %v758_v18 = vld [vmem:[#allocation2 + $0x778] sm:$0xff] }
 0x204   :  { %952 = vmatprep.mubr.bf16.mxu0 %v518_v20  ;;  %1116 = vmatprep.mubr.bf16.mxu1 %v518_v20  ;;  %v755_v20 = vld [vmem:[#allocation2 + $0x760] sm:$0xff] }
 0x206   :  { %923 = vmatpush1.bf16.msra.mxu0 %v715_v35  ;;  %1087 = vmatpush1.bf16.msra.mxu1 %v717_v41  ;;  %v757_v35 = vld [vmem:[#allocation2 + $0x770] sm:$0xff]  ;;  %v760_v41 = vld [vmem:[#allocation2 + $0x788] sm:$0xff] }
 0x207   :  { %924 = vmatprep.subr.bf16.mxu0 %v720_v21  ;;  %1088 = vmatprep.subr.bf16.mxu1 %v722_v22  ;;  %v762_v21 = vld [vmem:[#allocation2 + $0x798] sm:$0xff]  ;;  %v759_v22 = vld [vmem:[#allocation2 + $0x780] sm:$0xff] }
 0x20a   :  { %925 = vmatpush1.bf16.msra.mxu0 %v719_v24  ;;  %1089 = vmatpush1.bf16.msra.mxu1 %v721_v49  ;;  %v761_v24 = vld [vmem:[#allocation2 + $0x790] sm:$0xff]  ;;  %v764_v49 = vld [vmem:[#allocation2 + $0x7a8] sm:$0xff] }
 0x20b   :  { %926 = vmatprep.subr.bf16.mxu0 %v724_v25  ;;  %1090 = vmatprep.subr.bf16.mxu1 %v726_v57  ;;  %v766_v25 = vld [vmem:[#allocation2 + $0x7b8] sm:$0xff]  ;;  %v763_v57 = vld [vmem:[#allocation2 + $0x7a0] sm:$0xff] }
 0x20e   :  { %927 = vmatpush1.bf16.msra.mxu0 %v723_v19  ;;  %1091 = vmatpush1.bf16.msra.mxu1 %v725_v27  ;;  %v765_v19 = vld [vmem:[#allocation2 + $0x7b0] sm:$0xff]  ;;  %v768_v27 = vld [vmem:[#allocation2 + $0x7c8] sm:$0xff] }
 0x20f   :  { %928 = vmatprep.subr.bf16.mxu0 %v728_v28  ;;  %1092 = vmatprep.subr.bf16.mxu1 %v730_v30  ;;  %v770_v28 = vld [vmem:[#allocation2 + $0x7d8] sm:$0xff]  ;;  %v767_v30 = vld [vmem:[#allocation2 + $0x7c0] sm:$0xff] }
 0x212   :  { %929 = vmatpush1.bf16.msra.mxu0 %v727_v23  ;;  %1093 = vmatpush1.bf16.msra.mxu1 %v729_v29  ;;  %v769_v23 = vld [vmem:[#allocation2 + $0x7d0] sm:$0xff]  ;;  %v772_v29 = vld [vmem:[#allocation2 + $0x7e8] sm:$0xff] }
 0x213   :  { %930 = vmatprep.subr.bf16.mxu0 %v732_v59  ;;  %1094 = vmatprep.subr.bf16.mxu1 %v734_v17  ;;  %v774_v59 = vld [vmem:[#allocation2 + $0x7f8] sm:$0xff]  ;;  %v771_v17 = vld [vmem:[#allocation2 + $0x7e0] sm:$0xff] }
 0x216   :  { %931 = vmatpush1.bf16.msra.mxu0 %v731_v32  ;;  %1095 = vmatpush1.bf16.msra.mxu1 %v733_v38  ;;  %v773_v32 = vld [vmem:[#allocation2 + $0x7f0] sm:$0xff]  ;;  %v517_v38 = vpack.c.bf16 %v505_v51, %v505_v51 }
 0x217   :  { %932 = vmatprep.subr.bf16.mxu0 %v736_v33  ;;  %1096 = vmatprep.subr.bf16.mxu1 %v738_v43  ;;  %v775_v33 = vld [vmem:[%s2093_s3 + $0x8] sm:$0xf] }
 0x218   :  { %v780_v43 = vrot.slane %v775_v33, %v1938_v53  ;;  %v792_v47 = vrot.slane %v775_v33, %v225_v16 }
 0x21a   :  { %933 = vmatpush1.bf16.msra.mxu0 %v735_v34  ;;  %1097 = vmatpush1.bf16.msra.mxu1 %v737_v26  ;;  %v788_v34 = vrot.slane %v775_v33, %v221_v61  ;;  %v784_v26 = vrot.slane %v775_v33, %v1944_v55 }
 0x21b   :  { %934 = vmatprep.subr.bf16.mxu0 %v740_v36  ;;  %1098 = vmatprep.subr.bf16.mxu1 %v742_v31 }
 0x21e   :  { %935 = vmatpush1.bf16.msra.mxu0 %v739_v37  ;;  %1099 = vmatpush1.bf16.msra.mxu1 %v741_v39 }
 0x21f   :  { %936 = vmatprep.subr.bf16.mxu0 %v744_v40  ;;  %1100 = vmatprep.subr.bf16.mxu1 %v746_v42 }
 0x222   :  { %937 = vmatpush1.bf16.msra.mxu0 %v743_v44  ;;  %1101 = vmatpush1.bf16.msra.mxu1 %v745_v45 }
 0x223   :  { %938 = vmatprep.subr.bf16.mxu0 %v748_v46  ;;  %1102 = vmatprep.subr.bf16.mxu1 %v750_v48 }
 0x226   :  { %939 = vmatpush1.bf16.msra.mxu0 %v747_v50  ;;  %1103 = vmatpush1.bf16.msra.mxu1 %v749_v56 }
 0x227   :  { %940 = vmatprep.subr.bf16.mxu0 %v752_v58  ;;  %1104 = vmatprep.subr.bf16.mxu1 %v754_v60 }
 0x22a   :  { %941 = vmatpush1.bf16.msra.mxu0 %v751_v62  ;;  %1105 = vmatpush1.bf16.msra.mxu1 %v753_v54 }
 0x22b   :  { %942 = vmatprep.subr.bf16.mxu0 %v756_v63  ;;  %1106 = vmatprep.subr.bf16.mxu1 %v758_v18 }
 0x22e   :  { %943 = vmatpush1.bf16.msra.mxu0 %v755_v20  ;;  %1107 = vmatpush1.bf16.msra.mxu1 %v757_v35 }
 0x22f   :  { %944 = vmatprep.subr.bf16.mxu0 %v760_v41  ;;  %1108 = vmatprep.subr.bf16.mxu1 %v762_v21 }
 0x232   :  { %945 = vmatpush1.bf16.msra.mxu0 %v759_v22  ;;  %1109 = vmatpush1.bf16.msra.mxu1 %v761_v24 }
 0x233   :  { %946 = vmatprep.subr.bf16.mxu0 %v764_v49  ;;  %1110 = vmatprep.subr.bf16.mxu1 %v766_v25 }
 0x236   :  { %947 = vmatpush1.bf16.msra.mxu0 %v763_v57  ;;  %1111 = vmatpush1.bf16.msra.mxu1 %v765_v19 }
 0x237   :  { %948 = vmatprep.subr.bf16.mxu0 %v768_v27  ;;  %1112 = vmatprep.subr.bf16.mxu1 %v770_v28 }
 0x23a   :  { %949 = vmatpush1.bf16.msra.mxu0 %v767_v30  ;;  %1113 = vmatpush1.bf16.msra.mxu1 %v769_v23 }
 0x23b   :  { %950 = vmatprep.subr.bf16.mxu0 %v772_v29  ;;  %1114 = vmatprep.subr.bf16.mxu1 %v774_v59 }
 0x23e   :  { %951 = vmatpush1.bf16.msra.mxu0 %v771_v17  ;;  %1115 = vmatpush1.bf16.msra.mxu1 %v773_v32 }
 0x241   :  { %953 = vmatmul.mubr.bf16.vlgmr.msra.gmra.mrb[0].mxu0 %v517_v38  ;;  %1117 = vmatmul.mubr.bf16.vlgmr.msra.gmra.mrb[16].mxu1 %v517_v38 }
 0x314   :  { %v954_v36 = vpop.f32.mrb[0].mxu0  ;;  %v1118_v51 = vpop.f32.mrb[16].mxu1 }
 0x315   :  { %v2009_v31 = vadd.f32 %v954_v36, %v780_v43  ;;  %v2011_v37 = vadd.f32 %v1118_v51, %v788_v34  ;;  %v956_v39 = vpop.f32.mrb[1].mxu0  ;;  %v1120_v40 = vpop.f32.mrb[17].mxu1 }
 0x316   :  { %v1615_v42 = vadd.f32 %v956_v39, %v784_v26  ;;  %v2013_v44 = vadd.f32 %v1120_v40, %v792_v47  ;;  %v958_v45 = vpop.f32.mrb[2].mxu0  ;;  %v1122_v46 = vpop.f32.mrb[18].mxu1 }
 0x317   :  { %v1125_v61 = vmax.f32 %v2009_v31, 0.0  ;;  %v1127_v48 = vmax.f32 %v2011_v37, 0.0  ;;  %v959_v50 = vpop.f32.mrb[3].mxu0  ;;  %v1123_v52 = vpop.f32.mrb[19].mxu1 }
 0x318   :  { %v1126_v16 = vmax.f32 %v1615_v42, 0.0  ;;  %v1128_v56 = vmax.f32 %v2013_v44, 0.0 }
 0x319   :  { %1749 = dma.done.wait [#allocation5 + $0x1], 8192 }
 0x31a   :  { %1750 = vsyncadd [#allocation5 + $0x1], 4294959104  ;;  %v1134_v58 = vpack.c.bf16 %v1126_v16, %v1126_v16  ;;  %v1138_v60 = vld [vmem:[#allocation3 + $0x8] sm:$0xff]  ;;  %v1137_v62 = vld [vmem:[#allocation3] sm:$0xff]  ;;  %v1133_v42 = vpack.c.bf16 %v1125_v61, %v1125_v61  ;;  %v1136_v45 = vpack.c.bf16 %v1128_v56, %v1128_v56  ;;  %1563 = vmatprep.subr.bf16.mxu1 %v1894_v8 }
 0x31b   :  { %v1140_v54 = vld [vmem:[#allocation3 + $0x18] sm:$0xff]  ;;  %1213 = vmatprep.subr.bf16.mxu0 %v1138_v60  ;;  %v1139_v63 = vld [vmem:[#allocation3 + $0x10] sm:$0xff]  ;;  %v1142_v18 = vld [vmem:[#allocation3 + $0x28] sm:$0xff] }
 0x31c   :  { %1245 = vmatprep.mubr.bf16.mxu0 %v1134_v58  ;;  %1214 = vmatpush1.bf16.msra.mxu0 %v1137_v62  ;;  %v1141_v20 = vld [vmem:[#allocation3 + $0x20] sm:$0xff]  ;;  %v1144_v35 = vld [vmem:[#allocation3 + $0x38] sm:$0xff]  ;;  %v1143_v41 = vld [vmem:[#allocation3 + $0x30] sm:$0xff] }
 0x31d   :  { %1215 = vmatprep.subr.bf16.mxu0 %v1140_v54  ;;  %v1146_v21 = vld [vmem:[#allocation3 + $0x48] sm:$0xff]  ;;  %v1145_v22 = vld [vmem:[#allocation3 + $0x40] sm:$0xff]  ;;  %v1148_v24 = vld [vmem:[#allocation3 + $0x58] sm:$0xff] }
 0x31e   :  { %v1147_v49 = vld [vmem:[#allocation3 + $0x50] sm:$0xff]  ;;  %v1150_v25 = vld [vmem:[#allocation3 + $0x68] sm:$0xff]  ;;  %v1149_v57 = vld [vmem:[#allocation3 + $0x60] sm:$0xff] }
 0x31f   :  { %v1152_v19 = vld [vmem:[#allocation3 + $0x78] sm:$0xff]  ;;  %v1151_v27 = vld [vmem:[#allocation3 + $0x70] sm:$0xff]  ;;  %v1154_v28 = vld [vmem:[#allocation3 + $0x88] sm:$0xff] }
 0x320   :  { %1216 = vmatpush1.bf16.msra.mxu0 %v1139_v63  ;;  %v1153_v30 = vld [vmem:[#allocation3 + $0x80] sm:$0xff]  ;;  %v1156_v23 = vld [vmem:[#allocation3 + $0x98] sm:$0xff]  ;;  %v1155_v29 = vld [vmem:[#allocation3 + $0x90] sm:$0xff] }
 0x321   :  { %1217 = vmatprep.subr.bf16.mxu0 %v1142_v18  ;;  %v1158_v59 = vld [vmem:[#allocation3 + $0xa8] sm:$0xff]  ;;  %v1157_v17 = vld [vmem:[#allocation3 + $0xa0] sm:$0xff]  ;;  %v1160_v32 = vld [vmem:[#allocation3 + $0xb8] sm:$0xff] }
 0x322   :  { %v1159_v38 = vld [vmem:[#allocation3 + $0xb0] sm:$0xff]  ;;  %v1162_v33 = vld [vmem:[#allocation3 + $0xc8] sm:$0xff]  ;;  %v1161_v43 = vld [vmem:[#allocation3 + $0xc0] sm:$0xff] }
 0x323   :  { %v1164_v34 = vld [vmem:[#allocation3 + $0xd8] sm:$0xff]  ;;  %v1163_v26 = vld [vmem:[#allocation3 + $0xd0] sm:$0xff]  ;;  %v1166_v47 = vld [vmem:[#allocation3 + $0xe8] sm:$0xff] }
 0x324   :  { %1218 = vmatpush1.bf16.msra.mxu0 %v1141_v20  ;;  %v1165_v36 = vld [vmem:[#allocation3 + $0xe0] sm:$0xff]  ;;  %v1168_v51 = vld [vmem:[#allocation3 + $0xf8] sm:$0xff]  ;;  %v1167_v39 = vld [vmem:[#allocation3 + $0xf0] sm:$0xff] }
 0x325   :  { %1219 = vmatprep.subr.bf16.mxu0 %v1144_v35  ;;  %v1170_v40 = vld [vmem:[#allocation3 + $0x108] sm:$0xff]  ;;  %v1169_v46 = vld [vmem:[#allocation3 + $0x100] sm:$0xff]  ;;  %v1172_v50 = vld [vmem:[#allocation3 + $0x118] sm:$0xff] }
 0x326   :  { %v1171_v52 = vld [vmem:[#allocation3 + $0x110] sm:$0xff]  ;;  %v1174_v16 = vld [vmem:[#allocation3 + $0x128] sm:$0xff]  ;;  %v1173_v58 = vld [vmem:[#allocation3 + $0x120] sm:$0xff] }
 0x327   :  { %v1176_v31 = vld [vmem:[#allocation3 + $0x138] sm:$0xff]  ;;  %v1175_v61 = vld [vmem:[#allocation3 + $0x130] sm:$0xff]  ;;  %v1178_v60 = vld [vmem:[#allocation3 + $0x148] sm:$0xff] }
 0x328   :  { %1220 = vmatpush1.bf16.msra.mxu0 %v1143_v41  ;;  %v1177_v44 = vld [vmem:[#allocation3 + $0x140] sm:$0xff]  ;;  %v1180_v56 = vld [vmem:[#allocation3 + $0x158] sm:$0xff]  ;;  %v1179_v62 = vld [vmem:[#allocation3 + $0x150] sm:$0xff] }
 0x329   :  { %1221 = vmatprep.subr.bf16.mxu0 %v1146_v21  ;;  %v1182_v54 = vld [vmem:[#allocation3 + $0x168] sm:$0xff]  ;;  %v1181_v63 = vld [vmem:[#allocation3 + $0x160] sm:$0xff]  ;;  %v1184_v18 = vld [vmem:[#allocation3 + $0x178] sm:$0xff] }
 0x32a   :  { %v1183_v20 = vld [vmem:[#allocation3 + $0x170] sm:$0xff]  ;;  %v1186_v35 = vld [vmem:[#allocation3 + $0x188] sm:$0xff]  ;;  %v1185_v41 = vld [vmem:[#allocation3 + $0x180] sm:$0xff] }
 0x32b   :  { %v1188_v21 = vld [vmem:[#allocation3 + $0x198] sm:$0xff] }
 0x32c   :  { %1222 = vmatpush1.bf16.msra.mxu0 %v1145_v22  ;;  %v1187_v22 = vld [vmem:[#allocation3 + $0x190] sm:$0xff] }
 0x32d   :  { %1223 = vmatprep.subr.bf16.mxu0 %v1148_v24  ;;  %v1190_v24 = vld [vmem:[#allocation3 + $0x1a8] sm:$0xff] }
 0x330   :  { %1224 = vmatpush1.bf16.msra.mxu0 %v1147_v49  ;;  %v1189_v49 = vld [vmem:[#allocation3 + $0x1a0] sm:$0xff] }
 0x331   :  { %1225 = vmatprep.subr.bf16.mxu0 %v1150_v25  ;;  %v1192_v25 = vld [vmem:[#allocation3 + $0x1b8] sm:$0xff] }
 0x334   :  { %1226 = vmatpush1.bf16.msra.mxu0 %v1149_v57  ;;  %v1191_v57 = vld [vmem:[#allocation3 + $0x1b0] sm:$0xff] }
 0x335   :  { %1227 = vmatprep.subr.bf16.mxu0 %v1152_v19  ;;  %v1194_v19 = vld [vmem:[#allocation3 + $0x1c8] sm:$0xff] }
 0x338   :  { %1228 = vmatpush1.bf16.msra.mxu0 %v1151_v27  ;;  %v1193_v27 = vld [vmem:[#allocation3 + $0x1c0] sm:$0xff] }
 0x339   :  { %1229 = vmatprep.subr.bf16.mxu0 %v1154_v28  ;;  %v1196_v28 = vld [vmem:[#allocation3 + $0x1d8] sm:$0xff] }
 0x33c   :  { %1230 = vmatpush1.bf16.msra.mxu0 %v1153_v30  ;;  %v1195_v30 = vld [vmem:[#allocation3 + $0x1d0] sm:$0xff] }
 0x33d   :  { %1231 = vmatprep.subr.bf16.mxu0 %v1156_v23  ;;  %v1198_v23 = vld [vmem:[#allocation3 + $0x1e8] sm:$0xff] }
 0x340   :  { %1232 = vmatpush1.bf16.msra.mxu0 %v1155_v29  ;;  %v1197_v29 = vld [vmem:[#allocation3 + $0x1e0] sm:$0xff] }
 0x341   :  { %1233 = vmatprep.subr.bf16.mxu0 %v1158_v59  ;;  %v1200_v59 = vld [vmem:[#allocation3 + $0x1f8] sm:$0xff] }
 0x344   :  { %1234 = vmatpush1.bf16.msra.mxu0 %v1157_v17  ;;  %v1199_v17 = vld [vmem:[#allocation3 + $0x1f0] sm:$0xff] }
 0x345   :  { %1235 = vmatprep.subr.bf16.mxu0 %v1160_v32  ;;  %v1135_v32 = vpack.c.bf16 %v1127_v48, %v1127_v48 }
 0x348   :  { %1236 = vmatpush1.bf16.msra.mxu0 %v1159_v38  ;;  %v1201_v38 = vld [vmem:[%s2093_s3 + $0xc] sm:$0x3] }
 0x349   :  { %1237 = vmatprep.subr.bf16.mxu0 %v1162_v33  ;;  %v1206_v33 = vrot.slane %v1201_v38, %v1938_v53 }
 0x34c   :  { %1238 = vmatpush1.bf16.msra.mxu0 %v1161_v43  ;;  %v1210_v43 = vrot.slane %v1201_v38, %v1944_v55 }
 0x34d   :  { %1239 = vmatprep.subr.bf16.mxu0 %v1164_v34 }
 0x350   :  { %1240 = vmatpush1.bf16.msra.mxu0 %v1163_v26 }
 0x351   :  { %1241 = vmatprep.subr.bf16.mxu0 %v1166_v47 }
 0x354   :  { %1242 = vmatpush1.bf16.msra.mxu0 %v1165_v36 }
 0x355   :  { %1243 = vmatprep.subr.bf16.mxu0 %v1168_v51 }
 0x358   :  { %1244 = vmatpush1.bf16.msra.mxu0 %v1167_v39 }
 0x359   :  { %1254 = vmatprep.subr.bf16.mxu0 %v1170_v40 }
 0x35b   :  { %1246 = vmatmul.mubr.bf16.vlgmr.msra.gmra.mrb[4].mxu0 %v1133_v42 }
 0x35c   :  { %1255 = vmatpush1.bf16.msra.mxu0 %v1169_v46  ;;  %1286 = vmatprep.mubr.bf16.mxu0 %v1136_v45 }
 0x35d   :  { %1256 = vmatprep.subr.bf16.mxu0 %v1172_v50 }
 0x360   :  { %1257 = vmatpush1.bf16.msra.mxu0 %v1171_v52 }
 0x361   :  { %1258 = vmatprep.subr.bf16.mxu0 %v1174_v16 }
 0x364   :  { %1259 = vmatpush1.bf16.msra.mxu0 %v1173_v58 }
 0x365   :  { %1260 = vmatprep.subr.bf16.mxu0 %v1176_v31 }
 0x368   :  { %1261 = vmatpush1.bf16.msra.mxu0 %v1175_v61 }
 0x369   :  { %1262 = vmatprep.subr.bf16.mxu0 %v1178_v60 }
 0x36c   :  { %1263 = vmatpush1.bf16.msra.mxu0 %v1177_v44 }
 0x36d   :  { %1264 = vmatprep.subr.bf16.mxu0 %v1180_v56 }
 0x370   :  { %1265 = vmatpush1.bf16.msra.mxu0 %v1179_v62 }
 0x371   :  { %1266 = vmatprep.subr.bf16.mxu0 %v1182_v54 }
 0x374   :  { %1267 = vmatpush1.bf16.msra.mxu0 %v1181_v63 }
 0x375   :  { %1268 = vmatprep.subr.bf16.mxu0 %v1184_v18 }
 0x378   :  { %1269 = vmatpush1.bf16.msra.mxu0 %v1183_v20 }
 0x379   :  { %1270 = vmatprep.subr.bf16.mxu0 %v1186_v35 }
 0x37c   :  { %1271 = vmatpush1.bf16.msra.mxu0 %v1185_v41 }
 0x37d   :  { %1272 = vmatprep.subr.bf16.mxu0 %v1188_v21 }
 0x380   :  { %1273 = vmatpush1.bf16.msra.mxu0 %v1187_v22 }
 0x381   :  { %1274 = vmatprep.subr.bf16.mxu0 %v1190_v24 }
 0x384   :  { %1275 = vmatpush1.bf16.msra.mxu0 %v1189_v49 }
 0x385   :  { %1276 = vmatprep.subr.bf16.mxu0 %v1192_v25 }
 0x388   :  { %1277 = vmatpush1.bf16.msra.mxu0 %v1191_v57 }
 0x389   :  { %1278 = vmatprep.subr.bf16.mxu0 %v1194_v19 }
 0x38c   :  { %1279 = vmatpush1.bf16.msra.mxu0 %v1193_v27 }
 0x38d   :  { %1280 = vmatprep.subr.bf16.mxu0 %v1196_v28 }
 0x390   :  { %1281 = vmatpush1.bf16.msra.mxu0 %v1195_v30 }
 0x391   :  { %1282 = vmatprep.subr.bf16.mxu0 %v1198_v23 }
 0x394   :  { %1283 = vmatpush1.bf16.msra.mxu0 %v1197_v29 }
 0x395   :  { %1284 = vmatprep.subr.bf16.mxu0 %v1200_v59 }
 0x398   :  { %1285 = vmatpush1.bf16.msra.mxu0 %v1199_v17 }
 0x39b   :  { %1287 = vmatmul.mubr.bf16.vlgmr.msra.gmra.mrb[4].mxu0 %v1135_v32 }
 0x46e   :  { %v1288_v34 = vpop.f32.mrb[4].mxu0 }
 0x46f   :  { %v1618_v26 = vadd.f32 %v1288_v34, %v1206_v33  ;;  %v1290_v47 = vpop.f32.mrb[5].mxu0 }
 0x470   :  { %v1619_v36 = vadd.f32 %v1290_v47, %v1210_v43  ;;  %v1292_v51 = vpop.f32.mrb[6].mxu0 }
 0x471   :  { %v1295_v39 = vmax.f32 %v1618_v26, 0.0  ;;  %v1293_v40 = vpop.f32.mrb[7].mxu0 }
 0x472   :  { %v1296_v37 = vmax.f32 %v1619_v36, 0.0 }
 0x474   :  { %v1302_v48 = vpack.c.bf16 %v1296_v37, %v1296_v37 }
 0x475   :  { %1751 = dma.done.wait [#allocation5 + $0x2], 2048 }
 0x476   :  { %1752 = vsyncadd [#allocation5 + $0x2], 4294965248  ;;  %1564 = vmatpush3.bf16.msra.mxu1 %v1854_v0  ;;  %1358 = vmatprep.mubr.bf16.mxu1 %v1302_v48  ;;  %v1301_v0 = vpack.c.bf16 %v1295_v39, %v1295_v39  ;;  %v1673_v8 = vld [vmem:[%s2092_s2 + $0x30] sm:$0xff]   ;;  %vm1772_vm1 = vmmov 0   ;;  %v1551_v45 = vld [vmem:[%s2093_s3 + $0xf] ss:$0 sm:$0xff] }
 0x477   :  { %1565 = vmatprep.subr.bf16.mxu1 %v1899_v9  ;;  %v1674_v9 = vld [vmem:[%s2092_s2 + $0x38] sm:$0xff]   ;;  %vm1480_vm2 = vcmask 25600  }
 0x47a   :  { %1566 = vmatpush3.bf16.msra.mxu1 %v1859_v1  ;;  %v1667_v1 = vld [vmem:[%s2092_s2] sm:$0xff]  }
 0x47b   :  { %1567 = vmatprep.subr.bf16.mxu1 %v1904_v10 }
 0x47e   :  { %1568 = vmatpush3.bf16.msra.mxu1 %v1864_v2  ;;  %v1771_v2 = vmov 0.0  }
 0x47f   :  { %1569 = vmatprep.subr.bf16.mxu1 %v1909_v11  ;;  %v1550_v11 = vld [vmem:[%s2093_s3 + $0xe] ss:$0 sm:$0xff] }
 0x482   :  { %1570 = vmatpush3.bf16.msra.mxu1 %v1869_v3  ;;  %v1668_v3 = vld [vmem:[%s2092_s2 + $0x8] sm:$0xff]  }
 0x483   :  { %1571 = vmatprep.subr.bf16.mxu1 %v1914_v12 }
 0x486   :  { %1572 = vmatpush3.bf16.msra.mxu1 %v1874_v4  ;;  %v1669_v4 = vld [vmem:[%s2092_s2 + $0x10] sm:$0xff]  }
 0x487   :  { %1573 = vmatprep.subr.bf16.mxu1 %v1919_v13 }
 0x48a   :  { %1574 = vmatpush3.bf16.msra.mxu1 %v1879_v5  ;;  %v1670_v5 = vld [vmem:[%s2092_s2 + $0x18] sm:$0xff]  }
 0x48b   :  { %1575 = vmatprep.subr.bf16.mxu1 %v1924_v14 }
 0x48e   :  { %1576 = vmatpush3.bf16.msra.mxu1 %v1884_v6  ;;  %v1671_v6 = vld [vmem:[%s2092_s2 + $0x20] sm:$0xff]  }
 0x48f   :  { %1577 = vmatprep.subr.bf16.mxu1 %v1929_v15 }
 0x492   :  { %1578 = vmatpush3.bf16.msra.mxu1 %v1889_v7  ;;  %v1672_v7 = vld [vmem:[%s2092_s2 + $0x28] sm:$0xff]   ;;  %s1773_s2 = smov [#allocation11]  }
 0x493   :  { %1594 = vmatprep.subr.bf16.mxu1 %v1771_v2  ;;  %s1488_s23 = sshll.u32 %s1773_s2, 4  ;;  %s1489_s23 = int_to_ptr.vmem [resolvable:$true] %s1488_s23 }
 0x494   :  { %s1721_s24 = scalar_lea.vmem %s1489_s23, 32  ;;  %p1726_p3 = scmp.lt.s32.totalorder %s1489_s23, %s1489_s23 }
 0x495   :  { %1359 = vmatmul.mubr.bf16.vlgmr.msra.gmra.mrb[20].mxu1 %v1301_v0  ;;  %p1722_p2 = scmp.ne.s32.totalorder %s1489_s23, %s1721_s24  ;;  %p1727_p4 = scmp.lt.s32.totalorder %s1721_s24, %s1721_s24 }
 0x496   :  { %1595 = vmatpush3.bf16.msra.mxu1 %v1667_v1  ;;  %1610 = vmatprep.mubr.msk.bf16.mxu1 %vm1772_vm1, %v1771_v2 }
 0x497   :  { %1596 = vmatprep.subr.bf16.mxu1 %v1771_v2  ;;  %p1728_p5 = por %p1727_p4, %p1726_p3 }
 0x499   :  { %p1729_p6 = pnand %p1728_p5, %p1722_p2 }
 0x49a   :  { %1597 = vmatpush3.bf16.msra.mxu1 %v1668_v3 }
 0x49b   :  { %1598 = vmatprep.subr.bf16.mxu1 %v1771_v2 }
 0x49e   :  { %1599 = vmatpush3.bf16.msra.mxu1 %v1669_v4 }
 0x49f   :  { %1600 = vmatprep.subr.bf16.mxu1 %v1771_v2 }
 0x4a2   :  { %1601 = vmatpush3.bf16.msra.mxu1 %v1670_v5 }
 0x4a3   :  { %1602 = vmatprep.subr.bf16.mxu1 %v1771_v2 }
 0x4a6   :  { %1603 = vmatpush3.bf16.msra.mxu1 %v1671_v6 }
 0x4a7   :  { %1604 = vmatprep.subr.bf16.mxu1 %v1771_v2 }
 0x4aa   :  { %1605 = vmatpush3.bf16.msra.mxu1 %v1672_v7 }
 0x4ab   :  { %1606 = vmatprep.subr.bf16.mxu1 %v1771_v2 }
 0x4ae   :  { %1607 = vmatpush3.bf16.msra.mxu1 %v1673_v8 }
 0x4af   :  { %1608 = vmatprep.subr.bf16.mxu1 %v1771_v2 }
 0x4b2   :  { %1609 = vmatpush3.bf16.msra.mxu1 %v1674_v9 }
 0x568   :  { %v1579_v10 = vpop.f32.mrb[20].mxu1 }
 0x569   :  { %v1580_v12 = vpop.f32.mrb[21].mxu1 }
 0x56a   :  { %v1581_v13 = vadd.f32 %v1580_v12, %v1579_v10  ;;  %v1582_v14 = vpop.f32.mrb[22].mxu1 }
 0x56b   :  { %v1583_v15 = vpop.f32.mrb[23].mxu1 }
 0x56c   :  { %v1361_v53 = vadd.f32 %v1581_v13, %v1550_v11 }
 0x56e   :  { %v1366_v55 = vmax.f32 %v1361_v53, 0.0 }
 0x570   :  { %v1367_v42 = vpack.c.bf16 %v1366_v55, %v1366_v55 }
 0x572   :  { %1611 = vmatmul.mubr.bf16.vlgmr.msra.gmra.mrb[24].mxu1 %v1367_v42 }
 0x645   :  { %v1473_v46 = vpop.f32.mrb[24].mxu1 }
 0x646   :  { %v1474_v50 = vadd.f32 %v1551_v45, %v1473_v46  ;;  %v1612_v52 = vpop.f32.mrb[25].mxu1 }
 0x647   :  { %v1476_v16 = vpop.f32.mrb[26].mxu1 }
 0x648   :  { %1675 = vtanh.f32 %v1474_v50  ;;  %v1613_v58 = vpop.f32.mrb[27].mxu1 }
 0x652   :  { %v1676_v31 = vpop.eup %1675 }
 0x653   :  { %1481 = vst.msk [vmem:[#allocation11] sm:$0x3] %vm1480_vm2, %v1676_v31 }
 0x654   :  { %1732 = shalt.err (!%p1729_p6)
}
 0x655   :  { %s1733_s25 = scalar_lea.hbm %s2097_s7, 32 }
 0x656   :  { %p1734_p7 = scmp.ne.s32.totalorder %s2097_s7, %s1733_s25  ;;  %p1737_p8 = scmp.lt.u32.totalorder %s1733_s25, %s2097_s7 }
 0x658   :  { %p1739_p9 = pnand %p1737_p8, %p1734_p7 }
 0x65a   :  { %1742 = shalt.err (!%p1739_p9)
}
 0x65b   :  { %1491 = dma.vmem_to_hbm [thread:$0]  %s1489_s23, 32, %s2097_s7, [#allocation8]  }
 0x65c   :  { %1753 = dma.done.wait [#allocation8], 32  }
 0x65d   :  { %1754 = vsyncadd [#allocation8], 4294967264 }
 0x65e   :  { %1495 = vsyncpa [#allocation7], 1 }
 0x65f   :  { %1496 = vsyncpa [#allocation10], 1 }
 0x660   :  { %1497 = vsyncpa [#allocation8], 1 }
 0x661   :  { %1498 = vsyncmov [#allocation5] }
 0x664   :  { %s1499_s9 = vpop.sfrf %1498 }
 0x665   :  { %p1560_p10 = scmp.ne.s32.totalorder %s1499_s9, 0 }
 0x667   :  { %1503 = shalt.err (%p1560_p10)  }
 0x668   :  { %1505 = vsyncmov [#allocation5 + $0x1] }
 0x66b   :  { %s1506_s10 = vpop.sfrf %1505 }
 0x66c   :  { %p1561_p11 = scmp.ne.s32.totalorder %s1506_s10, 0 }
 0x66e   :  { %1510 = shalt.err (%p1561_p11)  }
 0x66f   :  { %1512 = vsyncmov [#allocation5 + $0x2] }
 0x672   :  { %s1513_s11 = vpop.sfrf %1512 }
 0x673   :  { %p1562_p12 = scmp.ne.s32.totalorder %s1513_s11, 0 }
 0x675   :  { %1517 = shalt.err (%p1562_p12)  }

</bundles_post_ra>
